<compile_context>
chip_gen: v6e
topology: v6e:2x2x1
jax: 0.10.0
libtpu: 0.0.40
codegen_flags: <defaults>
</compile_context>

<pallas_src>
import jax
import jax.numpy as jnp
from jax import lax
from jax.experimental import pallas as pl
from jax.experimental.pallas import tpu as pltpu

PAD_ID = 0
UNK_ID = 1
NEG_BIG = -1e30


# ----------------------------------------------------------------------------
# Small helpers
# ----------------------------------------------------------------------------
def _ceil_mult(x, m):
    return (x + m - 1) // m * m


def _padded_bytes(shape, dtype):
    dims = list(shape)
    while len(dims) < 2:
        dims = [1] + dims
    dims[-1] = _ceil_mult(dims[-1], 128)
    dims[-2] = _ceil_mult(dims[-2], 8)
    n = 1
    for d in dims:
        n *= d
    return n * jnp.dtype(dtype).itemsize


def _vmem_limit_bytes(resident, streamed):
    """Explicit scoped-VMEM budget: resident arrays + double-buffered streamed blocks."""
    total = sum(_padded_bytes(s, d) for s, d in resident)
    total += 2 * sum(_padded_bytes(s, d) for s, d in streamed)
    total = 2 * total + (4 << 20)                    # 2x margin + headroom
    return int(min(max(total, 32 << 20), 96 << 20))


# ----------------------------------------------------------------------------
# Encoder kernel: bidirectional GRU recurrence, grid over S.
# Input projections x @ W_ih + b_ih are hoisted into one-time XLA matmuls and streamed
# per step; fwd (time t) and bwd (time S-1-t) steps are interleaved in one grid step.
# ----------------------------------------------------------------------------
def encoder_kernel(gi_f_ref, gi_b_ref, lens_ref,
                   whh_f_ref, bhh_f_ref, whh_b_ref, bhh_b_ref,
                   fn_wf_ref, fn_wb_ref, fn_b_ref,
                   out_f_ref, out_b_ref, s_ref,
                   hf_scr, hb_scr):
    t = pl.program_id(0)
    S = pl.num_programs(0)
    B, H = hf_scr.shape

    @pl.when(t == 0)
    def _init():
        hf_scr[...] = jnp.zeros_like(hf_scr)
        hb_scr[...] = jnp.zeros_like(hb_scr)
        s_ref[...] = jnp.zeros_like(s_ref)

    lens = lens_ref[...]                                      # [B, 1] int32

    def gru_step(gi, h, whh_ref, bhh_ref):
        # PyTorch gate order (r, z, n); gi = x @ W_ih + b_ih precomputed outside.
        gh = jnp.dot(h.astype(jnp.bfloat16), whh_ref[...],
                     preferred_element_type=jnp.float32) + bhh_ref[...]
        r = jax.nn.sigmoid(gi[:, 0:H] + gh[:, 0:H])
        z = jax.nn.sigmoid(gi[:, H:2 * H] + gh[:, H:2 * H])
        n = jnp.tanh(gi[:, 2 * H:3 * H] + r * gh[:, 2 * H:3 * H])
        return (1.0 - z) * n + z * h

    # forward direction: time t
    valid_f = (t < lens).astype(jnp.float32)                  # [B, 1]
    hf = hf_scr[...]
    hf = valid_f * gru_step(gi_f_ref[0], hf, whh_f_ref, bhh_f_ref) + (1.0 - valid_f) * hf
    hf_scr[...] = hf
    out_f_ref[0] = (valid_f * hf).astype(out_f_ref.dtype)     # zero at padded steps

    # backward direction: time S-1-t
    t_b = S - 1 - t
    valid_b = (t_b < lens).astype(jnp.float32)
    hb = hb_scr[...]
    hb = valid_b * gru_step(gi_b_ref[0], hb, whh_b_ref, bhh_b_ref) + (1.0 - valid_b) * hb
    hb_scr[...] = hb
    out_b_ref[0] = (valid_b * hb).astype(out_b_ref.dtype)

    @pl.when(t == S - 1)
    def _final():
        # s = tanh(fn([h_fwd_final, h_bwd_final]))  (fn weights split -> no concat)
        s_ref[...] = jnp.tanh(
            jnp.dot(hf_scr[...].astype(jnp.bfloat16), fn_wf_ref[...],
                    preferred_element_type=jnp.float32)
            + jnp.dot(hb_scr[...].astype(jnp.bfloat16), fn_wb_ref[...],
                      preferred_element_type=jnp.float32)
            + fn_b_ref[...])


def run_encoder(params, gi_f, gi_b, lens_b1):
    S, B, three_h = gi_f.shape
    H = three_h // 3
    bf16 = jnp.bfloat16
    f32 = jnp.float32

    whh_f = params["enc_whh_f"].astype(bf16)
    whh_b = params["enc_whh_b"].astype(bf16)
    fn_wf = params["fn_wf"].astype(bf16)
    fn_wb = params["fn_wb"].astype(bf16)

    res2 = lambda t: (0, 0)

    vmem_limit = _vmem_limit_bytes(
        resident=[((B, 1), jnp.int32),
                  ((H, three_h), bf16), ((1, three_h), f32),
                  ((H, three_h), bf16), ((1, three_h), f32),
                  ((H, H), bf16), ((H, H), bf16), ((1, H), f32),
                  ((B, H), f32),                 # s output
                  ((B, H), f32), ((B, H), f32)],  # hidden-state scratches
        streamed=[((1, B, three_h), f32), ((1, B, three_h), f32),
                  ((1, B, H), bf16), ((1, B, H), bf16)])

    out_f, out_b, s0 = pl.pallas_call(
        encoder_kernel,
        grid=(S,),
        out_shape=(jax.ShapeDtypeStruct((S, B, H), bf16),
                   jax.ShapeDtypeStruct((S, B, H), bf16),
                   jax.ShapeDtypeStruct((B, H), f32)),
        in_specs=[
            pl.BlockSpec((1, B, three_h), lambda t: (t, 0, 0)),          # gi_f (per step)
            pl.BlockSpec((1, B, three_h), lambda t: (S - 1 - t, 0, 0)),  # gi_b (reversed)
            pl.BlockSpec((B, 1), res2),                                  # lengths
            pl.BlockSpec((H, three_h), res2), pl.BlockSpec((1, three_h), res2),
            pl.BlockSpec((H, three_h), res2), pl.BlockSpec((1, three_h), res2),
            pl.BlockSpec((H, H), res2), pl.BlockSpec((H, H), res2),
            pl.BlockSpec((1, H), res2),
        ],
        out_specs=(pl.BlockSpec((1, B, H), lambda t: (t, 0, 0)),
                   pl.BlockSpec((1, B, H), lambda t: (S - 1 - t, 0, 0)),
                   pl.BlockSpec((B, H), res2)),
        scratch_shapes=[pltpu.VMEM((B, H), f32), pltpu.VMEM((B, H), f32)],
        compiler_params=pltpu.CompilerParams(
            dimension_semantics=("arbitrary",),
            vmem_limit_bytes=vmem_limit),
    )(gi_f, gi_b, lens_b1,
      whh_f, params["enc_bhh_f"], whh_b, params["enc_bhh_b"],
      fn_wf, fn_wb, params["fn_b"])
    return out_f, out_b, s0


# ----------------------------------------------------------------------------
# Fused decoder kernel: grid=(T-1,). Weights / enc tensors resident (constant
# index_map), GRU state in scratch, coverage carried in its resident output block.
# Per-step outputs (p_gen*p_vocab, attention, (1-p_gen)*attention) stream out;
# the pointer scatter-add is hoisted to XLA.
# ----------------------------------------------------------------------------
def decoder_kernel(dec_emb_ref, empj_ref, s0_ref, enc_ref, encp_ref, lens_ref,
                   wcov_ref, v_w_ref, v_b_ref,
                   wih_e_ref, wih_c_ref, whh_ref, bih_ref, bhh_ref,
                   lin_h_ref, lin_c_ref, lin_e_ref, lin_b_ref,
                   wg_h_ref, wg_c_ref, wg_e_ref, wg_b_ref,
                   pvoc_ref, aw_ref, attw_ref, cov_ref,
                   s_scr):
    t = pl.program_id(0)
    B, H, S = encp_ref.shape                                  # encp stored [B, H, S_pad]

    @pl.when(t == 0)
    def _init():
        s_scr[...] = s0_ref[...]
        cov_ref[...] = jnp.zeros_like(cov_ref)

    emb = dec_emb_ref[0]                                      # [B, E] f32
    empj = empj_ref[0]                                        # [B, H, 1] f32 (hoisted proj)
    s = s_scr[...]                                            # [B, H] f32
    cov = cov_ref[...]                                        # [B, 1, S] f32 (lane-dense)

    # ---- attention with coverage: lane-dense along S; coverage term is rank-1 ----
    x = jnp.tanh(encp_ref[...].astype(jnp.float32) + empj + cov * wcov_ref[...])  # [B,H,S]
    att = jnp.sum(x * v_w_ref[...], axis=1, keepdims=True) + v_b_ref[...]         # [B,1,S]
    pos = lax.broadcasted_iota(jnp.int32, (B, 1, S), 2)
    att = jnp.where(pos >= lens_ref[...], NEG_BIG, att)       # finite mask -> no NaN risk
    m = jnp.max(att, axis=-1, keepdims=True)
    e = jnp.exp(att - m)
    aw = e * pl.reciprocal(jnp.sum(e, axis=-1, keepdims=True), approx=True)        # [B,1,S]
    cov_ref[...] = cov + aw

    # ---- context vector: [B,1,S] @ [B,S,2H] -> [B,2H] (bf16 MXU, f32 acc) ----
    c3 = jnp.einsum("bqs,bsk->bqk", aw.astype(jnp.bfloat16), enc_ref[...],
                    preferred_element_type=jnp.float32)
    c = c3[:, 0, :]                                           # [B, 2H] f32

    # ---- GRU cell (input weights split over [emb, context] -> no concat) ----
    emb_bf = emb.astype(jnp.bfloat16)
    c_bf = c.astype(jnp.bfloat16)
    gi = (jnp.dot(emb_bf, wih_e_ref[...], preferred_element_type=jnp.float32)
          + jnp.dot(c_bf, wih_c_ref[...], preferred_element_type=jnp.float32)
          + bih_ref[...])
    gh = jnp.dot(s.astype(jnp.bfloat16), whh_ref[...],
                 preferred_element_type=jnp.float32) + bhh_ref[...]
    r = jax.nn.sigmoid(gi[:, 0:H] + gh[:, 0:H])
    z = jax.nn.sigmoid(gi[:, H:2 * H] + gh[:, H:2 * H])
    n = jnp.tanh(gi[:, 2 * H:3 * H] + r * gh[:, 2 * H:3 * H])
    h_new = (1.0 - z) * n + z * s
    s_scr[...] = h_new

    # ---- vocab distribution on the lane-padded OOV-extended axis ----
    # lin_* pre-padded to Vp (multiple of 128); columns >= V have bias -1e30 so their
    # probability is exactly 0 -> one full-width, lane-dense store.
    logits = (jnp.dot(h_new.astype(jnp.bfloat16), lin_h_ref[...],
                      preferred_element_type=jnp.float32)
              + jnp.dot(c_bf, lin_c_ref[...], preferred_element_type=jnp.float32)
              + jnp.dot(emb_bf, lin_e_ref[...], preferred_element_type=jnp.float32)
              + lin_b_ref[...])                               # [B, Vp] f32
    logits = logits - jnp.max(logits, axis=-1, keepdims=True)
    pe = jnp.exp(logits)
    p_vocab = pe * pl.reciprocal(jnp.sum(pe, axis=-1, keepdims=True))

    p_gen = jax.nn.sigmoid(
        jnp.sum(h_new * wg_h_ref[...], axis=-1, keepdims=True)
        + jnp.sum(c * wg_c_ref[...], axis=-1, keepdims=True)
        + jnp.sum(emb * wg_e_ref[...], axis=-1, keepdims=True)
        + wg_b_ref[...])                                      # [B, 1]
    p_gen = jnp.clip(p_gen, 0.001, 0.999)

    # stream per-step results; pointer scatter-add is done once in XLA over all steps
    pvoc_ref[0] = p_gen * p_vocab                             # [B, Vp]
    aw_ref[0] = aw                                            # [B, 1, S] raw attention
    attw_ref[0] = (1.0 - p_gen)[:, :, None] * aw              # (1 - p_gen) * attention


def run_decoder(params, dec_emb, empj, s0, enc_pad, encp_t, lens_b11, Vext):
    Tm1, B, E = dec_emb.shape
    S_pad = enc_pad.shape[1]
    H = s0.shape[1]
    V = params["lin_b"].shape[1]
    Vp = _ceil_mult(Vext, 128)
    bf16 = jnp.bfloat16
    f32 = jnp.float32

    # Fold OOV extension + lane padding into the output projection (one-time padding).
    lin_h = jnp.pad(params["lin_h"], ((0, 0), (0, Vp - V))).astype(bf16)
    lin_c = jnp.pad(params["lin_c"], ((0, 0), (0, Vp - V))).astype(bf16)
    lin_e = jnp.pad(params["lin_e"], ((0, 0), (0, Vp - V))).astype(bf16)
    lin_b = jnp.concatenate(
        [params["lin_b"], jnp.full((1, Vp - V), NEG_BIG, f32)], axis=1)

    # coverage feature is H identical columns -> its attention contribution is rank-1
    wcov_col = jnp.sum(params["attn_wcov"], axis=0).reshape(H, 1)
    v_w_col = params["v_w"].reshape(H, 1)

    wih_e = params["dec_wih_e"].astype(bf16)
    wih_c = params["dec_wih_c"].astype(bf16)
    whh = params["dec_whh"].astype(bf16)

    res2 = lambda t: (0, 0)
    res3 = lambda t: (0, 0, 0)

    def r(shape):
        return pl.BlockSpec(shape, res2)

    in_specs = [
        pl.BlockSpec((1, B, E), lambda t: (t, 0, 0)),          # dec_emb (per step)
        pl.BlockSpec((1, B, H, 1), lambda t: (t, 0, 0, 0)),    # emb attention proj (per step)
        r((B, H)),                                             # s0
        pl.BlockSpec((B, S_pad, 2 * H), res3),                 # enc_output (resident, bf16)
        pl.BlockSpec((B, H, S_pad), res3),                     # enc projection^T (resident, bf16)
        pl.BlockSpec((B, 1, 1), res3),                         # lengths
        r((H, 1)), r((H, 1)), r((1, 1)),                       # wcov_col, v_w, v_b
        r((E, 3 * H)), r((2 * H, 3 * H)), r((H, 3 * H)), r((1, 3 * H)), r((1, 3 * H)),
        r((H, Vp)), r((2 * H, Vp)), r((E, Vp)), r((1, Vp)),
        r((1, H)), r((1, 2 * H)), r((1, E)), r((1, 1)),
    ]
    out_specs = (
        pl.BlockSpec((1, B, Vp), lambda t: (t, 0, 0)),              # p_gen * p_vocab
        pl.BlockSpec((1, B, 1, S_pad), lambda t: (t, 0, 0, 0)),     # raw attention
        pl.BlockSpec((1, B, 1, S_pad), lambda t: (t, 0, 0, 0)),     # (1-p_gen)*attention
        pl.BlockSpec((B, 1, S_pad), res3),                          # coverage (carried)
    )
    out_shape = (
        jax.ShapeDtypeStruct((Tm1, B, Vp), f32),
        jax.ShapeDtypeStruct((Tm1, B, 1, S_pad), f32),
        jax.ShapeDtypeStruct((Tm1, B, 1, S_pad), f32),
        jax.ShapeDtypeStruct((B, 1, S_pad), f32),
    )

    vmem_limit = _vmem_limit_bytes(
        resident=[((B, H), f32), ((B, S_pad, 2 * H), bf16), ((B, H, S_pad), bf16),
                  ((B, 1, 1), jnp.int32),
                  ((H, 1), f32), ((H, 1), f32), ((1, 1), f32),
                  ((E, 3 * H), bf16), ((2 * H, 3 * H), bf16), ((H, 3 * H), bf16),
                  ((1, 3 * H), f32), ((1, 3 * H), f32),
                  ((H, Vp), bf16), ((2 * H, Vp), bf16), ((E, Vp), bf16), ((1, Vp), f32),
                  ((1, H), f32), ((1, 2 * H), f32), ((1, E), f32), ((1, 1), f32),
                  ((B, 1, S_pad), f32), ((B, H), f32)],
        streamed=[((1, B, E), f32), ((1, B, H, 1), f32),
                  ((1, B, Vp), f32), ((1, B, 1, S_pad), f32), ((1, B, 1, S_pad), f32)])

    return pl.pallas_call(
        decoder_kernel,
        grid=(Tm1,),
        out_shape=out_shape,
        in_specs=in_specs,
        out_specs=out_specs,
        scratch_shapes=[pltpu.VMEM((B, H), f32)],              # GRU state carry
        compiler_params=pltpu.CompilerParams(
            dimension_semantics=("arbitrary",),
            vmem_limit_bytes=vmem_limit),
    )(dec_emb, empj, s0, enc_pad, encp_t, lens_b11,
      wcov_col, v_w_col, params["v_b"],
      wih_e, wih_c, whh, params["dec_bih"], params["dec_bhh"],
      lin_h, lin_c, lin_e, lin_b,
      params["wg_h"], params["wg_c"], params["wg_e"], params["wg_b"])


# ----------------------------------------------------------------------------
# Parameter init (deterministic, synthetic; weights already stored in split form)
# ----------------------------------------------------------------------------
def make_params(key, V, E, H):
    ks = jax.random.split(key, 31)

    def init(k, shape, scale=0.1):
        return (scale * jax.random.normal(k, shape)).astype(jnp.float32)

    emb = init(ks[0], (V, E)).at[PAD_ID].set(0.0)              # padding_idx=0
    return dict(
        emb=emb,
        enc_wih_f=init(ks[1], (E, 3 * H)), enc_whh_f=init(ks[2], (H, 3 * H)),
        enc_bih_f=init(ks[3], (1, 3 * H)), enc_bhh_f=init(ks[4], (1, 3 * H)),
        enc_wih_b=init(ks[5], (E, 3 * H)), enc_whh_b=init(ks[6], (H, 3 * H)),
        enc_bih_b=init(ks[7], (1, 3 * H)), enc_bhh_b=init(ks[8], (1, 3 * H)),
        fn_wf=init(ks[9], (H, H)), fn_wb=init(ks[10], (H, H)), fn_b=init(ks[11], (1, H)),
        # attention Linear(3H+E, H) split over input blocks [enc(2H), emb(E), cov(H)]
        attn_wenc=init(ks[12], (2 * H, H)), attn_wemb=init(ks[13], (E, H)),
        attn_wcov=init(ks[14], (H, H)), attn_b=init(ks[15], (1, H)),
        v_w=init(ks[16], (1, H)), v_b=init(ks[17], (1, 1)),
        # decoder GRU input weights split over [emb(E), context(2H)]
        dec_wih_e=init(ks[18], (E, 3 * H)), dec_wih_c=init(ks[19], (2 * H, 3 * H)),
        dec_whh=init(ks[20], (H, 3 * H)),
        dec_bih=init(ks[21], (1, 3 * H)), dec_bhh=init(ks[22], (1, 3 * H)),
        # output Linear(3H+E, V) split over [h(H), context(2H), emb(E)]
        lin_h=init(ks[23], (H, V)), lin_c=init(ks[24], (2 * H, V)),
        lin_e=init(ks[25], (E, V)), lin_b=init(ks[26], (1, V)),
        # w_gen Linear(3H+E, 1) split over [h(H), context(2H), emb(E)]
        wg_h=init(ks[27], (1, H)), wg_c=init(ks[28], (1, 2 * H)),
        wg_e=init(ks[29], (1, E)), wg_b=init(ks[30], (1, 1)),
    )


# ----------------------------------------------------------------------------
# PGN forward (one encoder kernel + one fused decoder kernel; glue in plain JAX)
# ----------------------------------------------------------------------------
def pgn_forward(params, src, tgt, src_lengths, len_oovs, teacher_forcing_ratio=1.0):
    V, E = params["emb"].shape
    H = params["dec_whh"].shape[0]
    B, S = src.shape
    T = tgt.shape[1]
    max_oov = int(max(len_oovs))
    Vext = V + max_oov
    S_pad = _ceil_mult(S, 128)

    src = src.astype(jnp.int32)
    tgt = tgt.astype(jnp.int32)
    src_copy = jnp.where(src >= V, UNK_ID, src)                # replace_oovs
    lens_b1 = src_lengths.reshape(B, 1).astype(jnp.int32)
    lens_b11 = src_lengths.reshape(B, 1, 1).astype(jnp.int32)

    # ---- encoder: hoist input projections (one-time matmuls), recur in Pallas ----
    emb_src = jnp.take(params["emb"], src_copy, axis=0)        # [B,S,E] (dropout = identity)
    emb_2d = jnp.transpose(emb_src, (1, 0, 2)).reshape(S * B, E)
    gi_f = (emb_2d @ params["enc_wih_f"] + params["enc_bih_f"]).reshape(S, B, 3 * H)
    gi_b = (emb_2d @ params["enc_wih_b"] + params["enc_bih_b"]).reshape(S, B, 3 * H)
    out_f, out_b, s0 = run_encoder(params, gi_f, gi_b, lens_b1)
    enc_output = jnp.transpose(jnp.concatenate([out_f, out_b], axis=-1), (1, 0, 2))  # [B,S,2H]

    # pad source axis to a lane multiple; padded positions are masked inside the kernel
    enc_pad = jnp.pad(enc_output, ((0, 0), (0, S_pad - S), (0, 0)))  # bf16 [B,S_pad,2H]

    # ---- Bahdanau hoist: encoder-side attention projection, stored transposed [B,H,S] ----
    encp_t = (jnp.einsum("bsk,kh->bhs", enc_pad.astype(jnp.float32), params["attn_wenc"])
              + params["attn_b"].reshape(1, H, 1)).astype(jnp.bfloat16)

    # ---- decoder inputs (always teacher-forced, faithful to the torch loop:
    #      step 0 feeds tgt[:,0]; step t>=1 feeds tgt[:,t-1]) ----
    dec_ids = jnp.concatenate([tgt[:, 0:1], tgt[:, 0:T - 2]], axis=1)   # [B, T-1]
    dec_ids = jnp.where(dec_ids >= V, UNK_ID, dec_ids)                  # replace_oovs
    dec_emb = jnp.transpose(jnp.take(params["emb"], dec_ids, axis=0), (1, 0, 2))  # [T-1,B,E]
    empj = (dec_emb.reshape((T - 1) * B, E) @ params["attn_wemb"]).reshape(T - 1, B, H)[..., None]

    pvoc, aw4, attw4, cov3 = run_decoder(params, dec_emb, empj, s0, enc_pad, encp_t,
                                         lens_b11, Vext)

    # ---- pointer scatter-add hoisted to XLA: one batched scatter over all T-1 steps ----
    attw = attw4[:, :, 0, :S]                                   # [T-1, B, S]
    t_idx = jnp.arange(T - 1)[:, None, None]
    b_idx = jnp.arange(B)[None, :, None]
    v_idx = jnp.broadcast_to(src[None, :, :], (T - 1, B, S))
    contrib = jnp.zeros((T - 1, B, Vext), jnp.float32).at[t_idx, b_idx, v_idx].add(attw)
    final = pvoc[:, :, :Vext] + contrib                         # [T-1, B, Vext]

    dec_outputs = jnp.concatenate(
        [jnp.transpose(final, (1, 0, 2)), jnp.zeros((B, 1, Vext), jnp.float32)], axis=1)
    a_last = aw4[T - 2, :, 0, :S]                               # last decode step's attention
    coverage = cov3[:, 0, :S]
    return dec_outputs, a_last, coverage


# ----------------------------------------------------------------------------
if __name__ == "__main__":
    V, E, H = 50, 32, 32
    B, S, T = 2, 8, 6
    len_oovs = [3, 4]

    key = jax.random.PRNGKey(0)
    k_par, k_src, k_tgt = jax.random.split(key, 3)
    params = make_params(k_par, V, E, H)

    src = jax.random.randint(k_src, (B, S), 2, V + max(len_oovs), dtype=jnp.int32)
    src_lengths = jnp.array([8, 5], dtype=jnp.int32)
    pos = jnp.arange(S)[None, :]
    src = jnp.where(pos < src_lengths[:, None], src, PAD_ID)            # pad tail with 0
    tgt = jax.random.randint(k_tgt, (B, T), 2, V, dtype=jnp.int32)

    dec_outputs, a, coverage = pgn_forward(params, src, tgt, src_lengths, len_oovs)
    jax.block_until_ready((dec_outputs, a, coverage))

    Vext = V + max(len_oovs)
    assert dec_outputs.shape == (B, T, Vext)
    assert a.shape == (B, S) and coverage.shape == (B, S)
    assert bool(jnp.all(jnp.isfinite(dec_outputs)))
    # each decoded step's distribution must sum to ~1 (p_gen*p_vocab + (1-p_gen)*a)
    sums = jnp.sum(dec_outputs[:, :T - 1, :], axis=-1)
    assert bool(jnp.all(jnp.abs(sums - 1.0) < 5e-3)), sums
    print("KERNEL_OK")
</pallas_src>

<mosaic_0001>
module attributes {stable_mosaic.version = 11 : i64} {
  func.func @encoder_kernel(%arg0: i32, %arg1: memref<1x2x96xf32, #tpu.memory_space<vmem>>, %arg2: memref<1x2x96xf32, #tpu.memory_space<vmem>>, %arg3: memref<2x1xi32, #tpu.memory_space<vmem>>, %arg4: memref<32x96xbf16, #tpu.memory_space<vmem>>, %arg5: memref<1x96xf32, #tpu.memory_space<vmem>>, %arg6: memref<32x96xbf16, #tpu.memory_space<vmem>>, %arg7: memref<1x96xf32, #tpu.memory_space<vmem>>, %arg8: memref<32x32xbf16, #tpu.memory_space<vmem>>, %arg9: memref<32x32xbf16, #tpu.memory_space<vmem>>, %arg10: memref<1x32xf32, #tpu.memory_space<vmem>>, %arg11: memref<1x2x32xbf16, #tpu.memory_space<vmem>>, %arg12: memref<1x2x32xbf16, #tpu.memory_space<vmem>>, %arg13: memref<2x32xf32, #tpu.memory_space<vmem>>, %arg14: memref<2x32xf32, #tpu.memory_space<vmem>>, %arg15: memref<2x32xf32, #tpu.memory_space<vmem>>) attributes {dimension_semantics = [#tpu.dimension_semantics<arbitrary>], iteration_bounds = array<i64: 8>, scalar_prefetch = 0 : i64, scratch_operands = 2 : i64, tpu.core_type = #tpu.core_type<tc>, window_params = [{transform_indices = @transform_0, window_bounds = array<i64: 1, 2, 96>}, {transform_indices = @transform_1, window_bounds = array<i64: 1, 2, 96>}, {pipeline_mode = #tpu.pipeline_mode<synchronous>, transform_indices = @transform_2, window_bounds = array<i64: 2, 1>}, {pipeline_mode = #tpu.pipeline_mode<synchronous>, transform_indices = @transform_3, window_bounds = array<i64: 32, 96>}, {pipeline_mode = #tpu.pipeline_mode<synchronous>, transform_indices = @transform_4, window_bounds = array<i64: 1, 96>}, {pipeline_mode = #tpu.pipeline_mode<synchronous>, transform_indices = @transform_5, window_bounds = array<i64: 32, 96>}, {pipeline_mode = #tpu.pipeline_mode<synchronous>, transform_indices = @transform_6, window_bounds = array<i64: 1, 96>}, {pipeline_mode = #tpu.pipeline_mode<synchronous>, transform_indices = @transform_7, window_bounds = array<i64: 32, 32>}, {pipeline_mode = #tpu.pipeline_mode<synchronous>, transform_indices = @transform_8, window_bounds = array<i64: 32, 32>}, {pipeline_mode = #tpu.pipeline_mode<synchronous>, transform_indices = @transform_9, window_bounds = array<i64: 1, 32>}, {transform_indices = @transform_10, window_bounds = array<i64: 1, 2, 32>}, {transform_indices = @transform_11, window_bounds = array<i64: 1, 2, 32>}, {pipeline_mode = #tpu.pipeline_mode<synchronous>, transform_indices = @transform_12, window_bounds = array<i64: 2, 32>}]} {
    %c0_i32 = arith.constant 0 : i32
    %0 = arith.cmpi eq, %arg0, %c0_i32 : i32
    %1 = arith.extui %0 : i1 to i32
    %c0_i32_0 = arith.constant 0 : i32
    %2 = arith.cmpi ne, %1, %c0_i32_0 : i32
    scf.if %2 {
      %cst_41 = arith.constant 0.000000e+00 : f32
      %114 = vector.broadcast %cst_41 : f32 to vector<2x32xf32>
      %c0_42 = arith.constant 0 : index
      %c0_43 = arith.constant 0 : index
      %115 = vector.load %arg14[%c0_42, %c0_43] : memref<2x32xf32, #tpu.memory_space<vmem>>, vector<2x32xf32>
      tpu.vector_store %arg14[%c0_42, %c0_43], %114 {strides = array<i32>} : memref<2x32xf32, #tpu.memory_space<vmem>>, vector<2x32xf32>,
      %cst_44 = arith.constant 0.000000e+00 : f32
      %116 = vector.broadcast %cst_44 : f32 to vector<2x32xf32>
      %c0_45 = arith.constant 0 : index
      %c0_46 = arith.constant 0 : index
      %117 = vector.load %arg15[%c0_45, %c0_46] : memref<2x32xf32, #tpu.memory_space<vmem>>, vector<2x32xf32>
      tpu.vector_store %arg15[%c0_45, %c0_46], %116 {strides = array<i32>} : memref<2x32xf32, #tpu.memory_space<vmem>>, vector<2x32xf32>,
      %cst_47 = arith.constant 0.000000e+00 : f32
      %118 = vector.broadcast %cst_47 : f32 to vector<2x32xf32>
      %c0_48 = arith.constant 0 : index
      %c0_49 = arith.constant 0 : index
      %119 = vector.load %arg13[%c0_48, %c0_49] : memref<2x32xf32, #tpu.memory_space<vmem>>, vector<2x32xf32>
      tpu.vector_store %arg13[%c0_48, %c0_49], %118 {strides = array<i32>} : memref<2x32xf32, #tpu.memory_space<vmem>>, vector<2x32xf32>,
    } else {
    }
    %c0 = arith.constant 0 : index
    %c0_1 = arith.constant 0 : index
    %3 = vector.load %arg3[%c0, %c0_1] : memref<2x1xi32, #tpu.memory_space<vmem>>, vector<2x1xi32>
    %4 = vector.broadcast %arg0 : i32 to vector<2x1xi32>
    %5 = arith.cmpi slt, %4, %3 : vector<2x1xi32>
    %6 = arith.extui %5 : vector<2x1xi1> to vector<2x1xi32>
    %7 = arith.sitofp %6 : vector<2x1xi32> to vector<2x1xf32>
    %c0_2 = arith.constant 0 : index
    %c0_3 = arith.constant 0 : index
    %8 = vector.load %arg14[%c0_2, %c0_3] : memref<2x32xf32, #tpu.memory_space<vmem>>, vector<2x32xf32>
    %c0_4 = arith.constant 0 : index
    %c0_5 = arith.constant 0 : index
    %c0_6 = arith.constant 0 : index
    %9 = vector.load %arg1[%c0_4, %c0_5, %c0_6] : memref<1x2x96xf32, #tpu.memory_space<vmem>>, vector<1x2x96xf32>
    %10 = vector.shape_cast %9 : vector<1x2x96xf32> to vector<2x96xf32>
    %11 = arith.truncf %8 : vector<2x32xf32> to vector<2x32xbf16>
    %c0_7 = arith.constant 0 : index
    %c0_8 = arith.constant 0 : index
    %12 = vector.load %arg4[%c0_7, %c0_8] : memref<32x96xbf16, #tpu.memory_space<vmem>>, vector<32x96xbf16>
    %cst = arith.constant dense<0.000000e+00> : vector<2x96xf32>
    %13 = tpu.matmul %11, %12, %cst {dimension_numbers = #tpu.dot_dimension_numbers<[1], [0], [0], [1], [0, 0, 1, 1], [], []>} : vector<2x32xbf16>, vector<32x96xbf16>, vector<2x96xf32> -> vector<2x96xf32>
    %c0_9 = arith.constant 0 : index
    %c0_10 = arith.constant 0 : index
    %14 = vector.load %arg5[%c0_9, %c0_10] : memref<1x96xf32, #tpu.memory_space<vmem>>, vector<1x96xf32>
    %15 = vector.broadcast %14 : vector<1x96xf32> to vector<2x96xf32>
    %16 = arith.addf %13, %15 : vector<2x96xf32>
    %17 = vector.extract_strided_slice %10 {offsets = [0, 0], sizes = [2, 32], strides = [1, 1]} : vector<2x96xf32> to vector<2x32xf32>
    %18 = vector.extract_strided_slice %16 {offsets = [0, 0], sizes = [2, 32], strides = [1, 1]} : vector<2x96xf32> to vector<2x32xf32>
    %19 = arith.addf %17, %18 : vector<2x32xf32>
    %20 = arith.negf %19 : vector<2x32xf32>
    %21 = math.exp %20 : vector<2x32xf32>
    %cst_11 = arith.constant 1.000000e+00 : f32
    %22 = vector.broadcast %cst_11 : f32 to vector<2x32xf32>
    %23 = arith.addf %22, %21 : vector<2x32xf32>
    %24 = arith.divf %22, %23 : vector<2x32xf32>
    %25 = vector.extract_strided_slice %10 {offsets = [0, 32], sizes = [2, 32], strides = [1, 1]} : vector<2x96xf32> to vector<2x32xf32>
    %26 = vector.extract_strided_slice %16 {offsets = [0, 32], sizes = [2, 32], strides = [1, 1]} : vector<2x96xf32> to vector<2x32xf32>
    %27 = arith.addf %25, %26 : vector<2x32xf32>
    %28 = arith.negf %27 : vector<2x32xf32>
    %29 = math.exp %28 : vector<2x32xf32>
    %cst_12 = arith.constant 1.000000e+00 : f32
    %30 = vector.broadcast %cst_12 : f32 to vector<2x32xf32>
    %31 = arith.addf %30, %29 : vector<2x32xf32>
    %32 = arith.divf %30, %31 : vector<2x32xf32>
    %33 = vector.extract_strided_slice %10 {offsets = [0, 64], sizes = [2, 32], strides = [1, 1]} : vector<2x96xf32> to vector<2x32xf32>
    %34 = vector.extract_strided_slice %16 {offsets = [0, 64], sizes = [2, 32], strides = [1, 1]} : vector<2x96xf32> to vector<2x32xf32>
    %35 = arith.mulf %24, %34 : vector<2x32xf32>
    %36 = arith.addf %33, %35 : vector<2x32xf32>
    %37 = math.tanh %36 : vector<2x32xf32>
    %cst_13 = arith.constant 1.000000e+00 : f32
    %38 = vector.broadcast %cst_13 : f32 to vector<2x32xf32>
    %39 = arith.subf %38, %32 : vector<2x32xf32>
    %40 = arith.mulf %39, %37 : vector<2x32xf32>
    %41 = arith.mulf %32, %8 : vector<2x32xf32>
    %42 = arith.addf %40, %41 : vector<2x32xf32>
    %43 = vector.broadcast %7 : vector<2x1xf32> to vector<2x32xf32>
    %44 = arith.mulf %43, %42 : vector<2x32xf32>
    %cst_14 = arith.constant 1.000000e+00 : f32
    %45 = vector.broadcast %cst_14 : f32 to vector<2x1xf32>
    %46 = arith.subf %45, %7 : vector<2x1xf32>
    %47 = vector.broadcast %46 : vector<2x1xf32> to vector<2x32xf32>
    %48 = arith.mulf %47, %8 : vector<2x32xf32>
    %49 = arith.addf %44, %48 : vector<2x32xf32>
    %c0_15 = arith.constant 0 : index
    %c0_16 = arith.constant 0 : index
    %50 = vector.load %arg14[%c0_15, %c0_16] : memref<2x32xf32, #tpu.memory_space<vmem>>, vector<2x32xf32>
    tpu.vector_store %arg14[%c0_15, %c0_16], %49 {strides = array<i32>} : memref<2x32xf32, #tpu.memory_space<vmem>>, vector<2x32xf32>,
    %51 = vector.broadcast %7 : vector<2x1xf32> to vector<2x32xf32>
    %52 = arith.mulf %51, %49 : vector<2x32xf32>
    %53 = arith.truncf %52 : vector<2x32xf32> to vector<2x32xbf16>
    %c0_17 = arith.constant 0 : index
    %c0_18 = arith.constant 0 : index
    %c0_19 = arith.constant 0 : index
    %54 = vector.load %arg11[%c0_17, %c0_18, %c0_19] : memref<1x2x32xbf16, #tpu.memory_space<vmem>>, vector<1x2x32xbf16>
    %55 = vector.shape_cast %54 : vector<1x2x32xbf16> to vector<2x32xbf16>
    %56 = vector.shape_cast %53 : vector<2x32xbf16> to vector<1x2x32xbf16>
    tpu.vector_store %arg11[%c0_17, %c0_18, %c0_19], %56 {strides = array<i32>} : memref<1x2x32xbf16, #tpu.memory_space<vmem>>, vector<1x2x32xbf16>,
    %c7_i32 = arith.constant 7 : i32
    %57 = arith.subi %c7_i32, %arg0 : i32
    %58 = vector.broadcast %57 : i32 to vector<2x1xi32>
    %59 = arith.cmpi slt, %58, %3 : vector<2x1xi32>
    %60 = arith.extui %59 : vector<2x1xi1> to vector<2x1xi32>
    %61 = arith.sitofp %60 : vector<2x1xi32> to vector<2x1xf32>
    %c0_20 = arith.constant 0 : index
    %c0_21 = arith.constant 0 : index
    %62 = vector.load %arg15[%c0_20, %c0_21] : memref<2x32xf32, #tpu.memory_space<vmem>>, vector<2x32xf32>
    %c0_22 = arith.constant 0 : index
    %c0_23 = arith.constant 0 : index
    %c0_24 = arith.constant 0 : index
    %63 = vector.load %arg2[%c0_22, %c0_23, %c0_24] : memref<1x2x96xf32, #tpu.memory_space<vmem>>, vector<1x2x96xf32>
    %64 = vector.shape_cast %63 : vector<1x2x96xf32> to vector<2x96xf32>
    %65 = arith.truncf %62 : vector<2x32xf32> to vector<2x32xbf16>
    %c0_25 = arith.constant 0 : index
    %c0_26 = arith.constant 0 : index
    %66 = vector.load %arg6[%c0_25, %c0_26] : memref<32x96xbf16, #tpu.memory_space<vmem>>, vector<32x96xbf16>
    %cst_27 = arith.constant dense<0.000000e+00> : vector<2x96xf32>
    %67 = tpu.matmul %65, %66, %cst_27 {dimension_numbers = #tpu.dot_dimension_numbers<[1], [0], [0], [1], [0, 0, 1, 1], [], []>} : vector<2x32xbf16>, vector<32x96xbf16>, vector<2x96xf32> -> vector<2x96xf32>
    %c0_28 = arith.constant 0 : index
    %c0_29 = arith.constant 0 : index
    %68 = vector.load %arg7[%c0_28, %c0_29] : memref<1x96xf32, #tpu.memory_space<vmem>>, vector<1x96xf32>
    %69 = vector.broadcast %68 : vector<1x96xf32> to vector<2x96xf32>
    %70 = arith.addf %67, %69 : vector<2x96xf32>
    %71 = vector.extract_strided_slice %64 {offsets = [0, 0], sizes = [2, 32], strides = [1, 1]} : vector<2x96xf32> to vector<2x32xf32>
    %72 = vector.extract_strided_slice %70 {offsets = [0, 0], sizes = [2, 32], strides = [1, 1]} : vector<2x96xf32> to vector<2x32xf32>
    %73 = arith.addf %71, %72 : vector<2x32xf32>
    %74 = arith.negf %73 : vector<2x32xf32>
    %75 = math.exp %74 : vector<2x32xf32>
    %cst_30 = arith.constant 1.000000e+00 : f32
    %76 = vector.broadcast %cst_30 : f32 to vector<2x32xf32>
    %77 = arith.addf %76, %75 : vector<2x32xf32>
    %78 = arith.divf %76, %77 : vector<2x32xf32>
    %79 = vector.extract_strided_slice %64 {offsets = [0, 32], sizes = [2, 32], strides = [1, 1]} : vector<2x96xf32> to vector<2x32xf32>
    %80 = vector.extract_strided_slice %70 {offsets = [0, 32], sizes = [2, 32], strides = [1, 1]} : vector<2x96xf32> to vector<2x32xf32>
    %81 = arith.addf %79, %80 : vector<2x32xf32>
    %82 = arith.negf %81 : vector<2x32xf32>
    %83 = math.exp %82 : vector<2x32xf32>
    %cst_31 = arith.constant 1.000000e+00 : f32
    %84 = vector.broadcast %cst_31 : f32 to vector<2x32xf32>
    %85 = arith.addf %84, %83 : vector<2x32xf32>
    %86 = arith.divf %84, %85 : vector<2x32xf32>
    %87 = vector.extract_strided_slice %64 {offsets = [0, 64], sizes = [2, 32], strides = [1, 1]} : vector<2x96xf32> to vector<2x32xf32>
    %88 = vector.extract_strided_slice %70 {offsets = [0, 64], sizes = [2, 32], strides = [1, 1]} : vector<2x96xf32> to vector<2x32xf32>
    %89 = arith.mulf %78, %88 : vector<2x32xf32>
    %90 = arith.addf %87, %89 : vector<2x32xf32>
    %91 = math.tanh %90 : vector<2x32xf32>
    %cst_32 = arith.constant 1.000000e+00 : f32
    %92 = vector.broadcast %cst_32 : f32 to vector<2x32xf32>
    %93 = arith.subf %92, %86 : vector<2x32xf32>
    %94 = arith.mulf %93, %91 : vector<2x32xf32>
    %95 = arith.mulf %86, %62 : vector<2x32xf32>
    %96 = arith.addf %94, %95 : vector<2x32xf32>
    %97 = vector.broadcast %61 : vector<2x1xf32> to vector<2x32xf32>
    %98 = arith.mulf %97, %96 : vector<2x32xf32>
    %cst_33 = arith.constant 1.000000e+00 : f32
    %99 = vector.broadcast %cst_33 : f32 to vector<2x1xf32>
    %100 = arith.subf %99, %61 : vector<2x1xf32>
    %101 = vector.broadcast %100 : vector<2x1xf32> to vector<2x32xf32>
    %102 = arith.mulf %101, %62 : vector<2x32xf32>
    %103 = arith.addf %98, %102 : vector<2x32xf32>
    %c0_34 = arith.constant 0 : index
    %c0_35 = arith.constant 0 : index
    %104 = vector.load %arg15[%c0_34, %c0_35] : memref<2x32xf32, #tpu.memory_space<vmem>>, vector<2x32xf32>
    tpu.vector_store %arg15[%c0_34, %c0_35], %103 {strides = array<i32>} : memref<2x32xf32, #tpu.memory_space<vmem>>, vector<2x32xf32>,
    %105 = vector.broadcast %61 : vector<2x1xf32> to vector<2x32xf32>
    %106 = arith.mulf %105, %103 : vector<2x32xf32>
    %107 = arith.truncf %106 : vector<2x32xf32> to vector<2x32xbf16>
    %c0_36 = arith.constant 0 : index
    %c0_37 = arith.constant 0 : index
    %c0_38 = arith.constant 0 : index
    %108 = vector.load %arg12[%c0_36, %c0_37, %c0_38] : memref<1x2x32xbf16, #tpu.memory_space<vmem>>, vector<1x2x32xbf16>
    %109 = vector.shape_cast %108 : vector<1x2x32xbf16> to vector<2x32xbf16>
    %110 = vector.shape_cast %107 : vector<2x32xbf16> to vector<1x2x32xbf16>
    tpu.vector_store %arg12[%c0_36, %c0_37, %c0_38], %110 {strides = array<i32>} : memref<1x2x32xbf16, #tpu.memory_space<vmem>>, vector<1x2x32xbf16>,
    %c7_i32_39 = arith.constant 7 : i32
    %111 = arith.cmpi eq, %arg0, %c7_i32_39 : i32
    %112 = arith.extui %111 : i1 to i32
    %c0_i32_40 = arith.constant 0 : i32
    %113 = arith.cmpi ne, %112, %c0_i32_40 : i32
    scf.if %113 {
      %c0_41 = arith.constant 0 : index
      %c0_42 = arith.constant 0 : index
      %114 = vector.load %arg14[%c0_41, %c0_42] : memref<2x32xf32, #tpu.memory_space<vmem>>, vector<2x32xf32>
      %115 = arith.truncf %114 : vector<2x32xf32> to vector<2x32xbf16>
      %c0_43 = arith.constant 0 : index
      %c0_44 = arith.constant 0 : index
      %116 = vector.load %arg8[%c0_43, %c0_44] : memref<32x32xbf16, #tpu.memory_space<vmem>>, vector<32x32xbf16>
      %cst_45 = arith.constant dense<0.000000e+00> : vector<2x32xf32>
      %117 = tpu.matmul %115, %116, %cst_45 {dimension_numbers = #tpu.dot_dimension_numbers<[1], [0], [0], [1], [0, 0, 1, 1], [], []>} : vector<2x32xbf16>, vector<32x32xbf16>, vector<2x32xf32> -> vector<2x32xf32>
      %c0_46 = arith.constant 0 : index
      %c0_47 = arith.constant 0 : index
      %118 = vector.load %arg15[%c0_46, %c0_47] : memref<2x32xf32, #tpu.memory_space<vmem>>, vector<2x32xf32>
      %119 = arith.truncf %118 : vector<2x32xf32> to vector<2x32xbf16>
      %c0_48 = arith.constant 0 : index
      %c0_49 = arith.constant 0 : index
      %120 = vector.load %arg9[%c0_48, %c0_49] : memref<32x32xbf16, #tpu.memory_space<vmem>>, vector<32x32xbf16>
      %cst_50 = arith.constant dense<0.000000e+00> : vector<2x32xf32>
      %121 = tpu.matmul %119, %120, %cst_50 {dimension_numbers = #tpu.dot_dimension_numbers<[1], [0], [0], [1], [0, 0, 1, 1], [], []>} : vector<2x32xbf16>, vector<32x32xbf16>, vector<2x32xf32> -> vector<2x32xf32>
      %122 = arith.addf %117, %121 : vector<2x32xf32>
      %c0_51 = arith.constant 0 : index
      %c0_52 = arith.constant 0 : index
      %123 = vector.load %arg10[%c0_51, %c0_52] : memref<1x32xf32, #tpu.memory_space<vmem>>, vector<1x32xf32>
      %124 = vector.broadcast %123 : vector<1x32xf32> to vector<2x32xf32>
      %125 = arith.addf %122, %124 : vector<2x32xf32>
      %126 = math.tanh %125 : vector<2x32xf32>
      %c0_53 = arith.constant 0 : index
      %c0_54 = arith.constant 0 : index
      %127 = vector.load %arg13[%c0_53, %c0_54] : memref<2x32xf32, #tpu.memory_space<vmem>>, vector<2x32xf32>
      tpu.vector_store %arg13[%c0_53, %c0_54], %126 {strides = array<i32>} : memref<2x32xf32, #tpu.memory_space<vmem>>, vector<2x32xf32>,
    } else {
    }
    return
  }
  func.func @transform_0(%arg0: i32) -> (i32, i32, i32) {
    %c0_i32 = arith.constant 0 : i32
    %c0_i32_0 = arith.constant 0 : i32
    %c0_i32_1 = arith.constant 0 : i32
    return %arg0, %c0_i32, %c0_i32_0 : i32, i32, i32
  }
  func.func @transform_1(%arg0: i32) -> (i32, i32, i32) {
    %c7_i32 = arith.constant 7 : i32
    %0 = arith.subi %c7_i32, %arg0 : i32
    %c0_i32 = arith.constant 0 : i32
    %c0_i32_0 = arith.constant 0 : i32
    %c0_i32_1 = arith.constant 0 : i32
    return %0, %c0_i32, %c0_i32_0 : i32, i32, i32
  }
  func.func @transform_2(%arg0: i32) -> (i32, i32) {
    %c0_i32 = arith.constant 0 : i32
    %c0_i32_0 = arith.constant 0 : i32
    %c0_i32_1 = arith.constant 0 : i32
    return %c0_i32, %c0_i32_0 : i32, i32
  }
  func.func @transform_3(%arg0: i32) -> (i32, i32) {
    %c0_i32 = arith.constant 0 : i32
    %c0_i32_0 = arith.constant 0 : i32
    %c0_i32_1 = arith.constant 0 : i32
    return %c0_i32, %c0_i32_0 : i32, i32
  }
  func.func @transform_4(%arg0: i32) -> (i32, i32) {
    %c0_i32 = arith.constant 0 : i32
    %c0_i32_0 = arith.constant 0 : i32
    %c0_i32_1 = arith.constant 0 : i32
    return %c0_i32, %c0_i32_0 : i32, i32
  }
  func.func @transform_5(%arg0: i32) -> (i32, i32) {
    %c0_i32 = arith.constant 0 : i32
    %c0_i32_0 = arith.constant 0 : i32
    %c0_i32_1 = arith.constant 0 : i32
    return %c0_i32, %c0_i32_0 : i32, i32
  }
  func.func @transform_6(%arg0: i32) -> (i32, i32) {
    %c0_i32 = arith.constant 0 : i32
    %c0_i32_0 = arith.constant 0 : i32
    %c0_i32_1 = arith.constant 0 : i32
    return %c0_i32, %c0_i32_0 : i32, i32
  }
  func.func @transform_7(%arg0: i32) -> (i32, i32) {
    %c0_i32 = arith.constant 0 : i32
    %c0_i32_0 = arith.constant 0 : i32
    %c0_i32_1 = arith.constant 0 : i32
    return %c0_i32, %c0_i32_0 : i32, i32
  }
  func.func @transform_8(%arg0: i32) -> (i32, i32) {
    %c0_i32 = arith.constant 0 : i32
    %c0_i32_0 = arith.constant 0 : i32
    %c0_i32_1 = arith.constant 0 : i32
    return %c0_i32, %c0_i32_0 : i32, i32
  }
  func.func @transform_9(%arg0: i32) -> (i32, i32) {
    %c0_i32 = arith.constant 0 : i32
    %c0_i32_0 = arith.constant 0 : i32
    %c0_i32_1 = arith.constant 0 : i32
    return %c0_i32, %c0_i32_0 : i32, i32
  }
  func.func @transform_10(%arg0: i32) -> (i32, i32, i32) {
    %c0_i32 = arith.constant 0 : i32
    %c0_i32_0 = arith.constant 0 : i32
    %c0_i32_1 = arith.constant 0 : i32
    return %arg0, %c0_i32, %c0_i32_0 : i32, i32, i32
  }
  func.func @transform_11(%arg0: i32) -> (i32, i32, i32) {
    %c7_i32 = arith.constant 7 : i32
    %0 = arith.subi %c7_i32, %arg0 : i32
    %c0_i32 = arith.constant 0 : i32
    %c0_i32_0 = arith.constant 0 : i32
    %c0_i32_1 = arith.constant 0 : i32
    return %0, %c0_i32, %c0_i32_0 : i32, i32, i32
  }
  func.func @transform_12(%arg0: i32) -> (i32, i32) {
    %c0_i32 = arith.constant 0 : i32
    %c0_i32_0 = arith.constant 0 : i32
    %c0_i32_1 = arith.constant 0 : i32
    return %c0_i32, %c0_i32_0 : i32, i32
  }
}

</mosaic_0001>

<bundles_post_ra>
// kernel: tpu_custom_call.1
= control target key start
LH: loop header
LB: loop body
LE: loop exit
PB: predicated region body
PF: predicated region fallthrough
CT: control target
= control target key end

     0   :  { %s2271_s0 = inlined_call_operand.hbm [shape: f32[8,2,96], index: 0, kind: input, shape index: {}]   ;;  %s2272_s1 = inlined_call_operand.hbm [shape: f32[8,2,96], index: 1, kind: input, shape index: {}]   ;;  %s2273_s2 = inlined_call_operand.vmem [shape: s32[2,1], index: 2, kind: input, shape index: {}]   ;;  %s2274_s3 = inlined_call_operand.hbm [shape: bf16[32,96], index: 3, kind: input, shape index: {}]   ;;  %s2275_s4 = inlined_call_operand.vmem [shape: f32[1,96], index: 4, kind: input, shape index: {}]   ;;  %s2276_s5 = inlined_call_operand.hbm [shape: bf16[32,96], index: 5, kind: input, shape index: {}]   ;;  %s2277_s6 = inlined_call_operand.hbm [shape: f32[1,96], index: 6, kind: input, shape index: {}]   ;;  %s2278_s7 = inlined_call_operand.hbm [shape: bf16[32,32], index: 7, kind: input, shape index: {}]   ;;  %s2279_s8 = inlined_call_operand.vmem [shape: bf16[32,32], index: 8, kind: input, shape index: {}]   ;;  %s2280_s9 = inlined_call_operand.vmem [shape: f32[1,32], index: 9, kind: input, shape index: {}]   ;;  %s2281_s10 = inlined_call_operand.hbm [shape: bf16[8,2,32], index: 10, kind: output, shape index: {0}]   ;;  %s2282_s11 = inlined_call_operand.hbm [shape: bf16[8,2,32], index: 11, kind: output, shape index: {1}]   ;;  %s2283_s12 = inlined_call_operand.hbm [shape: f32[2,32], index: 12, kind: output, shape index: {2}]  }
   0x1   :  { %2302 = sst [smem:[#allocation33_spill]] %s2271_s0 }
   0x2   :  { %2303 = sst [smem:[#allocation34_spill]] %s2274_s3 }
   0x3   :  { %2304 = sst [smem:[#allocation35_spill]] %s2276_s5 }
   0x4   :  { %2305 = sst [smem:[#allocation36_spill]] %s2277_s6 }
   0x5   :  { %2306 = sst [smem:[#allocation37_spill]] %s2278_s7 }
   0x6   :  { %2307 = sst [smem:[#allocation38_spill]] %s2281_s10 }
   0x7   :  { %2308 = sst [smem:[#allocation39_spill]] %s2283_s12 }
   0x8   :  { %18 = vsyncpa [#allocation5], 0 }
   0x9   :  { %20 = vsyncpa [#allocation5 + $0x1], 0 }
   0xa   :  { %21 = vsyncpa [#allocation8], 0 }
   0xb   :  { %23 = vsyncpa [#allocation8 + $0x1], 0 }
   0xc   :  { %24 = vsyncpa [#allocation11], 0 }
   0xd   :  { %25 = vsyncpa [#allocation14], 0 }
   0xe   :  { %26 = vsyncpa [#allocation6], 0 }
   0xf   :  { %28 = vsyncpa [#allocation6 + $0x1], 0 }
  0x10   :  { %29 = vsyncpa [#allocation17], 0 }
  0x11   :  { %31 = vsyncpa [#allocation17 + $0x1], 0  ;;  %s1854_s21 = smov 0   ;;  %s1856_s22 = smov 0  }
  0x12   :  { %s1858_s23 = smov 0   ;;  %s1860_s24 = smov 0  }
  0x13   :  { %s1862_s25 = smov 0   ;;  %s1864_s26 = smov 0  }
  0x14   :  { %s1866_s27 = smov 0  }
  0x15 LB: > { %2309 = sst [smem:[#allocation27_spill]] %s1754_s24  ;;  %s1768_s28 = smov [#allocation9]   ;;  %s1766_s27 = sphi %s1866_s27, %s2370_s27   ;;  %s1762_s26 = sphi %s1864_s26, %s2364_s26   ;;  %s1758_s25 = sphi %s1862_s25, %s2369_s25   ;;  %s1754_s24 = sphi %s1860_s24, %s2368_s24   ;;  %s1750_s23 = sphi %s1858_s23, %s2367_s23   ;;  %s1746_s22 = sphi %s1856_s22, %s2366_s22   ;;  %s1742_s21 = sphi %s1854_s21, %s2365_s21  }
  0x16   : > { %2310 = sst [smem:[#allocation28_spill]] %s1762_s26  ;;  %s354_s29 = sshll.u32 %s1768_s28, 4  ;;  %s355_s29 = int_to_ptr.vmem [resolvable:$true] %s354_s29 }
  0x17   : > { %s1890_s30 = sadd.s32 4294967295, %s1766_s27   ;;  %p1187_p0 = scmp.ge.s32.totalorder %s1766_s27, 1 }
  0x18   : > { %p2289_p1 = scmp.eq.s32.totalorder %s1890_s30, 0  ;;  %p339_p2 = scmp.lt.s32.totalorder %s1766_s27, 9 }
  0x19   : > { %s1769_s14 = smov [#allocation10]   ;;  %s1770_s17 = smov [#allocation12]  }
  0x1a   : > { %p1896_p4 = pnand %p1187_p0, %p339_p2  ;;  %s370_s15 = sshll.u32 %s1769_s14, 4  ;;  %s1908_s15 = int_to_ptr.vmem [resolvable:$true] %s370_s15 }
  0x1b   : > { %s384_s18 = sshll.u32 %s1770_s17, 4  ;;  %s1455_s19 = scalar_lea.vmem %s355_s29, 256  ;;  %s1910_s18 = int_to_ptr.vmem [resolvable:$true] %s384_s18 }
  0x1c   : > { %s2311_s13 = scalar_select %p1896_p4, 1, 0 }
  0x1d   : > { %p1303_p5 = pneg %p1896_p4  ;;  %p1456_p8 = scmp.ne.s32.totalorder %s355_s29, %s1455_s19 }
  0x1e   : > { %p1463_p11 = scmp.lt.s32.totalorder %s355_s29, %s355_s29  ;;  %p1464_p12 = scmp.lt.s32.totalorder %s1455_s19, %s1455_s19 }
  0x1f   : > { %p1904_p6 = pnand %p1303_p5, %p2289_p1 }
  0x20   : > { %p1465_p13 = por %p1464_p12, %p1463_p11 }
  0x21   : > { %p1446_p7 = pneg %p1904_p6 }
  0x23   : > { %p1458_p9 = pnand %p1456_p8, %p1446_p7 }
  0x25   : > { %p1459_p10 = pneg %p1458_p9 }
  0x27   : > { %p1466_p0 = pnand %p1465_p13, %p1459_p10 }
  0x29   : > { %1469 = shalt.err (!%p1466_p0)
}
  0x2a   : > { %s2284_s20 = smov 64   ;;  %s1772_s28 = smov 4  }
  0x2b   : > { %s2313_s3 = sld [smem:[#allocation34_spill]]  ;;  %s1481_s12 = scalar_lea.vmem %s1908_s15, 256 }
  0x2c   : > { %p1482_p2 = scmp.ne.s32.totalorder %s1908_s15, %s1481_s12  ;;  %p1489_p9 = scmp.lt.s32.totalorder %s1908_s15, %s1908_s15 }
  0x2d   : > { %p1490_p10 = scmp.lt.s32.totalorder %s1481_s12, %s1481_s12 }
  0x2e   : > { %p1484_p5 = pnand %p1482_p2, %p1446_p7 }
  0x2f   : > { %p1491_p11 = por %p1490_p10, %p1489_p9 }
  0x30   : > { %p1485_p8 = pneg %p1484_p5 }
  0x31   : > { %1306 = dma.hbm_to_vmem [thread:$0]  (!%p1904_p6), %s2313_s3, 256, %s355_s29, [#allocation8], %s2284_s20, %s2284_s20, %s1772_s28  }
  0x32   : > { %p1492_p12 = pnand %p1491_p11, %p1485_p8 }
  0x34   : > { %1495 = shalt.err (!%p1492_p12)
}
  0x35   : > { %s2314_s5 = sld [smem:[#allocation35_spill]]  ;;  %s1507_s14 = scalar_lea.vmem %s1910_s18, 16 }
  0x36   : > { %p1508_p13 = scmp.ne.s32.totalorder %s1910_s18, %s1507_s14  ;;  %s1514_s12 = scalar_lea.vmem %s1910_s18, 32 }
  0x37   : > { %p1515_p5 = scmp.lt.s32.totalorder %s1910_s18, %s1910_s18  ;;  %p1516_p8 = scmp.lt.s32.totalorder %s1514_s12, %s1507_s14 }
  0x38   : > { %p1510_p0 = pnand %p1508_p13, %p1446_p7 }
  0x39   : > { %p1517_p9 = por %p1516_p8, %p1515_p5 }
  0x3a   : > { %p1511_p2 = pneg %p1510_p0 }
  0x3b   : > { %1309 = dma.hbm_to_vmem [thread:$0]  (!%p1904_p6), %s2314_s5, 256, %s1908_s15, [#allocation11], %s2284_s20, %s2284_s20, %s1772_s28  }
  0x3c   : > { %p1518_p10 = pnand %p1517_p9, %p1511_p2 }
  0x3e   : > { %1521 = shalt.err (!%p1518_p10)
}
  0x3f   : > { %s2315_s6 = sld [smem:[#allocation36_spill]]  ;;  %s1773_s15 = smov [#allocation13]  }
  0x40   : > { %s394_s29 = sshll.u32 %s1773_s15, 4  ;;  %s395_s29 = int_to_ptr.vmem [resolvable:$true] %s394_s29 }
  0x41   : > { %s1533_s20 = scalar_lea.vmem %s395_s29, 256  ;;  %p1541_p0 = scmp.lt.s32.totalorder %s395_s29, %s395_s29 }
  0x42   : > { %p1534_p11 = scmp.ne.s32.totalorder %s395_s29, %s1533_s20  ;;  %p1542_p2 = scmp.lt.s32.totalorder %s1533_s20, %s1533_s20 }
  0x44   : > { %p1536_p12 = pnand %p1534_p11, %p1446_p7  ;;  %p1543_p5 = por %p1542_p2, %p1541_p0 }
  0x45   : > { %1312 = dma.hbm_to_vmem [thread:$0]  (!%p1904_p6), %s2315_s6, 16, %s1910_s18, [#allocation11]  }
  0x46   : > { %p1537_p13 = pneg %p1536_p12 }
  0x48   : > { %p1544_p8 = pnand %p1543_p5, %p1537_p13 }
  0x4a   : > { %1547 = shalt.err (!%p1544_p8)
}
  0x4b   : > { %s2316_s14 = smov 64   ;;  %s2317_s7 = sld [smem:[#allocation37_spill]] }
  0x4c   : > { %s2285_s16 = sadd.s32 4294967294, %s1766_s27   ;;  %p51_p7 = scmp.ne.s32.totalorder %s1762_s26, %s1758_s25 }
  0x4d   : > { %p2290_p9 = scmp.eq.s32.totalorder %s1766_s27, 0  ;;  %p57_p10 = scmp.ne.s32.totalorder %s1758_s25, %s1754_s24 }
  0x4e   : > { %p2287_p11 = scmp.eq.s32.totalorder %s1890_s30, 7  ;;  %p1978_p13 = scmp.eq.s32.totalorder %s2285_s16, 7 }
  0x4f   : > { %p53_p12 = por %p2290_p9, %p51_p7  ;;  %p1984_p0 = por %p2289_p1, %p57_p10 }
  0x50   : > { %s2318_s17 = scalar_select %p1978_p13, 1, 0 }
  0x51   : > { %1315 = dma.hbm_to_vmem [thread:$0]  (!%p1904_p6), %s2317_s7, 256, %s395_s29, [#allocation14], %s2316_s14, %s2316_s14, %s1772_s28  }
  0x52   : > { %s2319_s19 = scalar_select %p1984_p0, 1, 0 }
  0x53   : > { %p1990_p6 = por %p2287_p11, %p51_p7  ;;  %p1996_p2 = por %p1978_p13, %p57_p10 }
  0x54   : > { %p2288_p5 = scmp.lt.s32.totalorder %s1766_s27, 8  ;;  %s414_s29 = sand.u32 1, %s1762_s26  }
  0x55   : > { %s2320_s28 = scalar_select %p1990_p6, 1, 0 }
  0x56   : > { %s2322_s15 = scalar_select %p1996_p2, 1, 0 }
  0x57   : > { %2321 = sst [smem:[#allocation29_spill]] %s2320_s28  ;;  %s1194_s14 = sshll.u32 %s1766_s27, 5 }
  0x58   : > { %2323 = sst [smem:[#allocation30_spill]] %s2322_s15  ;;  %s1193_s18 = sshll.u32 %s414_s29, 1 }
  0x59   : > { %s2324_s0 = sld [smem:[#allocation33_spill]]  ;;  %s418_s3 = scalar_lea.vmem [#allocation4], %s1193_s18 }
  0x5a   : > { %s425_s5 = sshll.u32 %s418_s3, 4  ;;  %p2010_p8 = pnand %p2288_p5, %p53_p12  ;;  %s426_s5 = int_to_ptr.vmem [resolvable:$true] %s425_s5 }
  0x5b   : > { %s415_s7 = scalar_lea.sflag [#allocation5], %s414_s29 }
  0x5c   : > { %p1550_p10 = pneg %p2010_p8 }
  0x5f   : > { %s2006_s20 = scalar_lea.hbm %s2324_s0, %s1194_s14  ;;  %s1553_s12 = scalar_lea.hbm %s2324_s0, 256 }
  0x60   : > { %s1548_s15 = scalar_lea.hbm %s2006_s20, 32  ;;  %p1554_p12 = scmp.lt.s32.totalorder %s2006_s20, %s2324_s0 }
  0x61   : > { %p1549_p7 = scmp.ne.s32.totalorder %s2006_s20, %s1548_s15  ;;  %p1555_p5 = scmp.lt.s32.totalorder %s1553_s12, %s1548_s15 }
  0x63   : > { %p1551_p3 = pnand %p1550_p10, %p1549_p7  ;;  %p1556_p1 = por %p1555_p5, %p1554_p12 }
  0x65   : > { %p1552_p11 = pneg %p1551_p3 }
  0x67   : > { %p1557_p9 = pnand %p1556_p1, %p1552_p11 }
  0x69   : > { %1560 = shalt.err (!%p1557_p9)
}
  0x6a   : > { %s1561_s24 = scalar_lea.vmem %s426_s5, 32  ;;  %s1774_s29 = smov [#allocation4]  }
  0x6b   : > { %p1562_p2 = scmp.ne.s32.totalorder %s426_s5, %s1561_s24  ;;  %s1566_s10 = sshll.u32 %s1774_s29, 4  ;;  %s1567_s10 = int_to_ptr.vmem [resolvable:$false] %s1566_s10 }
  0x6c   : > { %s1568_s28 = scalar_lea.vmem %s1567_s10, 64  ;;  %p1569_p3 = scmp.lt.s32.totalorder %s426_s5, %s1567_s10 }
  0x6d   : > { %p1564_p6 = pnand %p1562_p2, %p1550_p10  ;;  %p1570_p7 = scmp.lt.s32.totalorder %s1568_s28, %s1561_s24 }
  0x6f   : > { %p1565_p0 = pneg %p1564_p6  ;;  %p1571_p4 = por %p1570_p7, %p1569_p3 }
  0x71   : > { %p1572_p13 = pnand %p1571_p4, %p1565_p0 }
  0x73   : > { %1575 = shalt.err (!%p1572_p13)
}
  0x74   : > { %1319 = dma.hbm_to_vmem [thread:$0]  (!%p2010_p8), %s2006_s20, 32, %s426_s5, %s415_s7  }
  0x75   : > { %s2029_s10 = sadd.s32 1, %s1766_s27   ;;  %s67_s6 = ssub.s32 7, %s1766_s27 }
  0x76   : > { %s41_s24 = ssub.s32 %s1766_s27, %s2029_s10  ;;  %s68_s28 = ssub.s32 7, %s2029_s10 }
  0x77   : > { %p42_p1 = scmp.eq.s32.totalorder %s41_s24, 0  ;;  %s69_s15 = ssub.s32 %s67_s6, %s68_s28 }
  0x78   : > { %p70_p4 = scmp.eq.s32.totalorder %s69_s15, 0  ;;  %s72_s16 = sadd.s32 1, %s1750_s23 }
  0x79   : > { %s2326_s14 = sadd.s32 1, %s1762_s26  ;;  %p79_p9 = scmp.ne.s32.totalorder %s1750_s23, %s1746_s22 }
  0x7a   : > { %s2039_s12 = scalar_select %p42_p1, %s1762_s26, %s2326_s14  }
  0x7b   : > { %s2042_s18 = scalar_select %p70_p4, %s1750_s23, %s72_s16  }
  0x7c   : > { %2327 = sst [smem:[#allocation31_spill]] %s2039_s12  ;;  %p85_p11 = scmp.ne.s32.totalorder %s1746_s22, %s1742_s21 }
  0x7d   : > { %2328 = sst [smem:[#allocation32_spill]] %s2042_s18  ;;  %s432_s5 = sand.u32 1, %s1766_s27  }
  0x7e   : > { %s434_s7 = sand.u32 1, %s1750_s23   ;;  %p2329_p13 = scmp.eq.s32.totalorder %s1766_s27, 0 }
  0x7f   : > { %p2330_p6 = scmp.eq.s32.totalorder %s1890_s30, 0  ;;  %p2332_p5 = scmp.eq.s32.totalorder %s1890_s30, 7 }
  0x80   : > { %p81_p0 = por %p79_p9, %p2329_p13  ;;  %p2334_p10 = scmp.ne.s32.totalorder %s2318_s17, 0 }
  0x81   : > { %p2054_p2 = por %p85_p11, %p2330_p6  ;;  %p2060_p8 = por %p2332_p5, %p79_p9 }
  0x82   : > { %p2066_p12 = por %p2334_p10, %p85_p11  ;;  %s1195_s21 = sshll.u32 %s434_s7, 1 }
  0x83   : > { %s2331_s20 = scalar_select %p2054_p2, 1, 0 }
  0x84   : > { %s2333_s3 = scalar_select %p2060_p8, 1, 0 }
  0x85   : > { %s2335_s29 = scalar_select %p2066_p12, 1, 0 }
  0x86   : > { %s1196_s24 = sshll.u32 %s67_s6, 5  ;;  %s436_s14 = scalar_lea.vmem [#allocation7], %s1195_s21 }
  0x87   : > { %s2073_s16 = scalar_lea.hbm %s2272_s1, %s1196_s24  ;;  %s444_s0 = sshll.u32 %s436_s14, 4  ;;  %s445_s0 = int_to_ptr.vmem [resolvable:$true] %s444_s0 }
  0x88   : > { %p2336_p3 = scmp.lt.s32.totalorder %s1766_s27, 8  ;;  %s433_s12 = scalar_lea.sflag [#allocation8], %s432_s5 }
  0x89   : > { %s1576_s7 = scalar_lea.hbm %s2073_s16, 32  ;;  %s1581_s28 = scalar_lea.hbm %s2272_s1, 256 }
  0x8a   : > { %p2077_p7 = pnand %p2336_p3, %p81_p0  ;;  %p1577_p1 = scmp.ne.s32.totalorder %s2073_s16, %s1576_s7 }
  0x8b   : > { %p1582_p13 = scmp.lt.s32.totalorder %s2073_s16, %s2272_s1  ;;  %p1583_p0 = scmp.lt.s32.totalorder %s1581_s28, %s1576_s7 }
  0x8c   : > { %p1578_p4 = pneg %p2077_p7 }
  0x8d   : > { %p1584_p6 = por %p1583_p0, %p1582_p13 }
  0x8e   : > { %p1579_p9 = pnand %p1578_p4, %p1577_p1 }
  0x90   : > { %p1580_p11 = pneg %p1579_p9 }
  0x92   : > { %p1585_p5 = pnand %p1584_p6, %p1580_p11 }
  0x94   : > { %1588 = shalt.err (!%p1585_p5)
}
  0x95   : > { %s1589_s14 = scalar_lea.vmem %s445_s0, 32  ;;  %s1775_s5 = smov [#allocation7]  }
  0x96   : > { %p1590_p10 = scmp.ne.s32.totalorder %s445_s0, %s1589_s14  ;;  %s1594_s26 = sshll.u32 %s1775_s5, 4  ;;  %s1595_s26 = int_to_ptr.vmem [resolvable:$false] %s1594_s26 }
  0x97   : > { %s1596_s18 = scalar_lea.vmem %s1595_s26, 64  ;;  %p1597_p1 = scmp.lt.s32.totalorder %s445_s0, %s1595_s26 }
  0x98   : > { %p1592_p3 = pnand %p1590_p10, %p1578_p4  ;;  %p1598_p9 = scmp.lt.s32.totalorder %s1596_s18, %s1589_s14 }
  0x9a   : > { %p1593_p12 = pneg %p1592_p3  ;;  %p1599_p8 = por %p1598_p9, %p1597_p1 }
  0x9c   : > { %p1600_p2 = pnand %p1599_p8, %p1593_p12 }
  0x9e   : > { %1603 = shalt.err (!%p1600_p2)
}
  0x9f   : > { %1322 = dma.hbm_to_vmem [thread:$0]  (!%p2077_p7), %s2073_s16, 32, %s445_s0, %s433_s12  }
  0xa0   : > { %p2338_p11 = scmp.ne.s32.totalorder %s2311_s13, 0 }
  0xa1   : > { %s2098_s7 = sand.u32 (!%p2338_p11), 1, %s1758_s25   ;;  %p2339_p4 = scmp.ne.s32.totalorder (!%p2338_p11), %s2319_s19, 0 }
  0xa2   : > { %453 = sbr.rel (%p2338_p11) target bundleno = 1191 (0x4a7), region = 60  ;;  %s1198_s6 = sshll.u32 (!%p2338_p11), %s2098_s7, 1 }
  0xa3   : > { %s456_s24 = scalar_lea.sflag (!%p2338_p11), [#allocation5], %s2098_s7  ;;  %s2102_s26 = scalar_lea.vmem (!%p2338_p11), [#allocation4], %s1198_s6 }
  0xa7   : > { %1709 = dma.done.wait (%p2339_p4), %s456_s24, 32  }
  0xa8   : > { %1711 = vsyncadd (%p2339_p4), %s456_s24, 4294967264  ;;  %s464_s0 = sand.u32 1, %s1890_s30   ;;  %s466_s13 = sand.u32 1, %s1746_s22  }
  0xa9   : > { %s2110_s12 = sshll.u32 %s466_s13, 1  ;;  %s465_s18 = scalar_lea.sflag [#allocation8], %s464_s0 }
  0xaa   : > { %s468_s16 = scalar_lea.vmem [#allocation7], %s2110_s12  ;;  %p2340_p2 = scmp.ne.s32.totalorder %s2331_s20, 0 }
  0xac   : > { %1713 = dma.done.wait (%p2340_p2), %s465_s18, 32  }
  0xad   : > { %1715 = vsyncadd (%p2340_p2), %s465_s18, 4294967264  ;;  %p2341_p8 = scmp.eq.s32.totalorder %s1890_s30, 0 }
  0xaf   : > { %1717 = dma.done.wait (%p2341_p8), [#allocation8], 256   ;;  %p2342_p12 = pmov %p2341_p8 }
  0xb0   : > { %p2343_p7 = pmov %p2341_p8 }
  0xb1   : > { %1719 = vsyncadd (%p2342_p12), [#allocation8], 4294967040 }
  0xb2   : > { %1721 = dma.done.wait (%p2343_p7), [#allocation11], 272   ;;  %p2344_p13 = pmov %p2343_p7 }
  0xb3   : > { %p2345_p0 = pmov %p2343_p7 }
  0xb4   : > { %1723 = vsyncadd (%p2344_p13), [#allocation11], 4294967024 }
  0xb5   : > { %1725 = dma.done.wait (%p2345_p0), [#allocation14], 256   ;;  %p2346_p6 = pmov %p2345_p0 }
  0xb6   : > { %s524_s19 = scalar_lea.vmem [#allocation15], %s2098_s7  ;;  %s2132_s20 = scalar_lea.vmem [#allocation16], %s466_s13 }
  0xb7   : > { %1727 = vsyncadd (%p2346_p6), [#allocation14], 4294967040  ;;  %p2347_p5 = scmp.ne.s32.totalorder %s1890_s30, 0 }
  0xb9   : > { %539 = sbr.rel (%p2347_p5) target bundleno = 193 (0xc1), region = 88 }
  0xbe   : > { %vm540_vm0 = vcmask 254976   ;;  %v1776_v0 = vmov 0.0  }
  0xbf   : > { %541 = vst.msk [vmem:[#allocation2] sm:$0x3] %vm540_vm0, %v1776_v0  ;;  %542 = vst.msk [vmem:[#allocation3] sm:$0x3] %vm540_vm0, %v1776_v0 }
  0xc0   : > { %543 = vst.msk [vmem:[#allocation18] sm:$0x3] %vm540_vm0, %v1776_v0 }
  0xc1 PF: > { %v1422_v1 = vld [vmem:[#allocation9 + $0x8] sm:$0xff]   ;;  %v1777_v2 = vmov 0.0   ;;  %v1423_v3 = vld [vmem:[#allocation10 + $0x8] sm:$0xff]   ;;  %v1424_v4 = vld [vmem:[#allocation9] sm:$0xff]   ;;  %vm1778_vm1 = vmmov 0   ;;  %vm575_vm2 = vcmask 261120   ;;  %v545_v16 = vstv %s1890_s30 }
  0xc2   : > { %1243 = vmatprep.subr.bf16.mxu0 %v1777_v2  ;;  %1251 = vmatprep.subr.bf16.mxu1 %v1777_v2  ;;  %v1425_v5 = vld [vmem:[#allocation10] sm:$0xff]   ;;  %s695_s17 = ssub.s32 7, %s1890_s30  ;;  %v1779_v12 = vmov 0   ;;  %v1212_v15 = vld [vmem:[#allocation12] ss:$0 sm:$0xff]  ;;  %s1780_s5 = smov 64   ;;  %v679_v0 = vlaneseq }
  0xc3   : > { %1244 = vmatpush3.bf16.msra.mxu0 %v1422_v1  ;;  %1247 = vmatprep.mubr.msk.bf16.mxu0 %vm1778_vm1, %v1777_v2  ;;  %v544_v10 = vld [vmem:[%s2273_s2] sm:$0x3]  ;;  %v696_v11 = vstv %s695_s17  ;;  %v550_v30 = vld [vmem:[%s2102_s26] sm:$0x3]  ;;  %v701_v32 = vld [vmem:[%s468_s16] sm:$0x3] }
  0xc4   : > { %1252 = vmatpush3.bf16.msra.mxu1 %v1423_v3  ;;  %1245 = vmatprep.subr.bf16.mxu0 %v1777_v2  ;;  %v1206_v13 = vld [vmem:[%s2275_s4] ss:$0 sm:$0xff]  ;;  %vm697_vm3 = vcmp.lt.s32.totalorder %v696_v11, %v544_v10  ;;  %vm546_vm4 = vcmp.lt.s32.totalorder %v545_v16, %v544_v10  ;;  %s1781_s6 = smov 32   ;;  %s1782_s24 = smov 96   ;;  %v1783_v3 = vmov 1966171168  }
  0xc5   : > { %1253 = vmatprep.subr.bf16.mxu1 %v1777_v2  ;;  %1255 = vmatprep.mubr.msk.bf16.mxu1 %vm1778_vm1, %v1777_v2  ;;  %v1211_v20 = vsel %vm697_vm3, 1.0, %v1777_v2  ;;  %v1205_v21 = vsel %vm546_vm4, 1.0, %v1777_v2  ;;  %v680_v10 = vshrl.u32 %v679_v0, 7  ;;  %vm671_vm5 = vcmask 254976   ;;  %p1217_p10 = scmp.ne.s32.totalorder %s1890_s30, 7 }
  0xc6   : > { %v2136_v6 = vld [vmem:[#allocation2] sm:$0x3]  ;;  %v2138_v7 = vld [vmem:[#allocation3] sm:$0x3]  ;;  %1416 = vset.pattern.permute.xlu1 %v1779_v12  ;;  %1415 = vset.pattern.permute.xlu0 %v1779_v12  ;;  %v1417_v24 = vpack.i.bf16 %v1211_v20, %v1205_v21  ;;  %v655_v29 = vsub.f32 1.0, %v1205_v21  ;;  %v805_v46 = vsub.f32 1.0, %v1211_v20 }
  0xc7   : > { %v551_v8 = vpack.c.bf16 %v2136_v6, %v2136_v6  ;;  %1246 = vmatpush3.bf16.msra.mxu0 %v1424_v4  ;;  %v702_v9 = vpack.c.bf16 %v2138_v7, %v2138_v7  ;;  %v677_v4 = vunpack.c.l.s4 %v1783_v3  ;;  %vm693_vm6 = vcmask 253952  }
  0xc8   : > { %1254 = vmatpush3.bf16.msra.mxu1 %v1425_v5 }
  0xca   : > { %1248 = vmatmul.mubr.msk.bf16.vlgmr.msra.gmra.mxu0 %vm575_vm2, %v551_v8 }
  0xcb   : > { %1256 = vmatmul.mubr.msk.bf16.vlgmr.msra.gmra.mxu1 %vm575_vm2, %v702_v9 }
 0x18a   : > { %v613_v14 = vpop.f32.mrf.mxu0 }
 0x18b   : > { %v614_v17 = vadd.f32 %v1206_v13, %v613_v14  ;;  %v763_v18 = vpop.f32.mrf.mxu1  ;;  %v678_v13 = vunpack.c.0.s8 %v677_v4 }
 0x18c   : > { %v1249_v19 = vpop.f32.mrf.mxu0  ;;  %v764_v22 = vadd.f32 %v1212_v15, %v763_v18 }
 0x18d   : > { %v1257_v23 = vpop.f32.mrf.mxu1  ;;  %627 = vrot.lane.b32.xlu0 %v614_v17, %s1780_s5  ;;  %v619_v31 = vadd.f32 %v614_v17, %v550_v30  ;;  %v681_v18 = vsub.s32 %v678_v13, %v680_v10 }
 0x18e   : > { %v616_v25 = vpop.f32.mrf.mxu0  ;;  %v769_v34 = vadd.f32 %v764_v22, %v701_v32 }
 0x18f   : > { %v766_v26 = vpop.f32.mrf.mxu1  ;;  %v1210_v33 = vmul.f32 -1.442695, %v619_v31 }
 0x190   : > { %v1250_v27 = vpop.f32.mrf.mxu0  ;;  %v1216_v35 = vmul.f32 -1.442695, %v769_v34 }
 0x191   : > { %v1258_v28 = vpop.f32.mrf.mxu1  ;;  %777 = vrot.lane.b32.xlu0 %v764_v22, %s1780_s5  ;;  %1426 = vpow2.f32 %v1210_v33 }
 0x192   : > { %1428 = vpow2.f32 %v1216_v35 }
 0x195   : > { %658 = vperm.xlu0 %1415, %v655_v29  }
 0x19e   : > { %v1427_v36 = vpop.eup %1426 }
 0x19f   : > { %v623_v37 = vadd.f32 1.0, %v1427_v36  ;;  %v1429_v38 = vpop.eup %1428 }
 0x1a0   : > { %v773_v39 = vadd.f32 1.0, %v1429_v38 }
 0x1a1   : > { %1430 = vrcp.f32 %v623_v37 }
 0x1a2   : > { %1432 = vrcp.f32 %v773_v39 }
 0x1ae   : > { %v1431_v40 = vpop.eup %1430 }
 0x1af   : > { %v1433_v43 = vpop.eup %1432  ;;  %v637_v59 = vsub.f32 1.0, %v1431_v40 }
 0x1b0   : > { %v787_v2 = vsub.f32 1.0, %v1433_v43 }
 0x1ff   : > { %v628_v41 = vpop.permute.xlu0 %627 }
 0x200   : > { %v630_v42 = vmul.f32 %v1431_v40, %v628_v41 }
 0x202   : > { %632 = vrot.lane.b32.xlu1 %v630_v42, %s1780_s5 }
 0x203   : > { %v778_v44 = vpop.permute.xlu0 %777 }
 0x204   : > { %v780_v45 = vmul.f32 %v1433_v43, %v778_v44 }
 0x206   : > { %782 = vrot.lane.b32.xlu1 %v780_v45, %s1780_s5 }
 0x20a   : > { %808 = vperm.xlu1 %1416, %v805_v46  }
 0x20e   : > { %1418 = vperm.xlu1 %1416, %v1417_v24  }
 0x210   : > { %v659_v54 = vpop.permute.xlu0 %658 }
 0x211   : > { %v661_v56 = vmul.f32 %v659_v54, %v2136_v6 }
 0x212   : > { %644 = vrot.lane.b32.xlu1 %v2136_v6, %s1781_s6 }
 0x216   : > { %794 = vrot.lane.b32.xlu1 %v2138_v7, %s1781_s6 }
 0x274   : > { %v633_v47 = vpop.permute.xlu1 %632 }
 0x275   : > { %v635_v48 = vadd.f32 %v633_v47, %v550_v30 }
 0x277   : > { %1434 = vtanh.f32 %v635_v48 }
 0x278   : > { %v783_v49 = vpop.permute.xlu1 %782 }
 0x279   : > { %v785_v50 = vadd.f32 %v783_v49, %v701_v32 }
 0x27b   : > { %1436 = vtanh.f32 %v785_v50 }
 0x284   : > { %v1435_v51 = vpop.eup %1434 }
 0x285   : > { %v809_v52 = vpop.permute.xlu1 %808  ;;  %639 = vrot.lane.b32.xlu0 %v1435_v51, %s1782_s24 }
 0x286   : > { %v811_v53 = vmul.f32 %v809_v52, %v2138_v7 }
 0x288   : > { %v1437_v55 = vpop.eup %1436  ;;  %813 = vrot.lane.b32.xlu1 %v811_v53, %s1781_s6 }
 0x289   : > { %789 = vrot.lane.b32.xlu0 %v1437_v55, %s1782_s24  ;;  %v1419_v57 = vpop.permute.xlu1 %1418 }
 0x28a   : > { %v1420_v7 = vunpack.i.l.bf16 %v1419_v57  ;;  %v1421_v11 = vunpack.i.h.bf16 %v1419_v57 }
 0x28d   : > { %663 = vrot.lane.b32.xlu0 %v661_v56, %s1781_s6  ;;  %v645_v58 = vpop.permute.xlu1 %644 }
 0x28e   : > { %v647_v61 = vmul.f32 %v1431_v40, %v645_v58 }
 0x291   : > { %v795_v63 = vpop.permute.xlu1 %794 }
 0x292   : > { %v797_v8 = vmul.f32 %v1433_v43, %v795_v63 }
 0x2f7   : > { %v640_v60 = vpop.permute.xlu0 %639 }
 0x2f8   : > { %v642_v62 = vmul.f32 %v640_v60, %v637_v59 }
 0x2fa   : > { %v648_v1 = vadd.f32 %v647_v61, %v642_v62  ;;  %v814_v15 = vpop.permute.xlu1 %813 }
 0x2fb   : > { %v790_v5 = vpop.permute.xlu0 %789 }
 0x2fc   : > { %v792_v9 = vmul.f32 %v790_v5, %v787_v2  ;;  %v654_v12 = vmul.f32 %v1420_v7, %v648_v1 }
 0x2fe   : > { %v798_v6 = vadd.f32 %v797_v8, %v792_v9 }
 0x2ff   : > { %v664_v14 = vpop.permute.xlu0 %663 }
 0x300   : > { %v666_v16 = vadd.f32 %v664_v14, %v654_v12  ;;  %v804_v17 = vmul.f32 %v1421_v11, %v798_v6 }
 0x302   : > { %v673_v19 = vmul.f32 %v1420_v7, %v666_v16  ;;  %v816_v20 = vadd.f32 %v814_v15, %v804_v17  ;;  %668 = vrot.lane.b32.xlu0 %v666_v16, %s1782_s24 }
 0x304   : > { %v674_v21 = vpack.c.bf16 %v673_v19, %v673_v19  ;;  %v822_v22 = vmul.f32 %v1421_v11, %v816_v20 }
 0x306   : > { %v682_v23 = vrot.slane %v674_v21, %v681_v18  ;;  %v823_v24 = vpack.c.bf16 %v822_v22, %v822_v22  ;;  %818 = vrot.lane.b32.xlu0 %v816_v20, %s1782_s24 }
 0x308   : > { %v831_v25 = vrot.slane %v823_v24, %v681_v18  ;;  %v689_v26 = vrot.slane %v682_v23, %v681_v18 }
 0x30a   : > { %690 = vrot.lane.b32.xlu1 %v689_v26, %s1782_s24  ;;  %v838_v27 = vrot.slane %v831_v25, %v681_v18 }
 0x30e   : > { %839 = vrot.lane.b32.xlu1 %v838_v27, %s1782_s24 }
 0x374   : > { %v669_v28 = vpop.permute.xlu0 %668 }
 0x375   : > { %672 = vst.msk [vmem:[#allocation2] sm:$0x3] %vm671_vm5, %v669_v28 }
 0x378   : > { %v819_v29 = vpop.permute.xlu0 %818 }
 0x379   : > { %821 = vst.msk [vmem:[#allocation3] sm:$0x3] %vm671_vm5, %v819_v29 }
 0x37c   : > { %v691_v30 = vpop.permute.xlu1 %690 }
 0x37d   : > { %694 = vst.msk [vmem:[%s524_s19] sm:$0x1] %vm693_vm6, %v691_v30  ;;  %846 = sbr.rel (%p1217_p10) target bundleno = 1120 (0x460), region = 92 }
 0x380   : > { %v840_v31 = vpop.permute.xlu1 %839 }
 0x381   : > { %842 = vst.msk [vmem:[%s2132_s20] sm:$0x1] %vm693_vm6, %v840_v31 }
 0x382   : > { %v1438_v32 = vld [vmem:[%s2279_s8 + $0x8] sm:$0xff]   ;;  %v1784_v33 = vmov 0.0   ;;  %v1439_v34 = vld [vmem:[#allocation13 + $0x8] sm:$0xff]   ;;  %v1440_v35 = vld [vmem:[%s2279_s8] sm:$0xff]   ;;  %vm1785_vm7 = vmmov 0  }
 0x383   : > { %1259 = vmatprep.subr.bf16.mxu0 %v1784_v33  ;;  %1267 = vmatprep.subr.bf16.mxu1 %v1784_v33  ;;  %v1441_v36 = vld [vmem:[#allocation13] sm:$0xff]   ;;  %v853_v37 = vld [vmem:[#allocation3] sm:$0x3]  ;;  %v847_v38 = vld [vmem:[#allocation2] sm:$0x3] }
 0x384   : > { %1260 = vmatpush3.bf16.msra.mxu0 %v1438_v32  ;;  %1263 = vmatprep.mubr.msk.bf16.mxu0 %vm1785_vm7, %v1784_v33  ;;  %v854_v39 = vpack.c.bf16 %v853_v37, %v853_v37  ;;  %v848_v40 = vpack.c.bf16 %v847_v38, %v847_v38  ;;  %v1224_v43 = vld [vmem:[%s2280_s9] ss:$0 sm:$0xff] }
 0x385   : > { %1268 = vmatpush3.bf16.msra.mxu1 %v1439_v34  ;;  %1261 = vmatprep.subr.bf16.mxu0 %v1784_v33 }
 0x386   : > { %1269 = vmatprep.subr.bf16.mxu1 %v1784_v33  ;;  %1271 = vmatprep.mubr.msk.bf16.mxu1 %vm1785_vm7, %v1784_v33 }
 0x388   : > { %1262 = vmatpush3.bf16.msra.mxu0 %v1440_v35 }
 0x389   : > { %1270 = vmatpush3.bf16.msra.mxu1 %v1441_v36 }
 0x38b   : > { %1264 = vmatmul.mubr.msk.bf16.vlgmr.msra.gmra.mxu0 %vm575_vm2, %v854_v39 }
 0x38c   : > { %1272 = vmatmul.mubr.msk.bf16.vlgmr.msra.gmra.mxu1 %vm575_vm2, %v848_v40 }
 0x44b   : > { %v908_v41 = vpop.f32.mrf.mxu0 }
 0x44c   : > { %v963_v42 = vpop.f32.mrf.mxu1 }
 0x44d   : > { %v964_v44 = vadd.f32 %v963_v42, %v908_v41  ;;  %v1265_v45 = vpop.f32.mrf.mxu0 }
 0x44e   : > { %v1273_v46 = vpop.f32.mrf.mxu1 }
 0x44f   : > { %v976_v47 = vadd.f32 %v1224_v43, %v964_v44  ;;  %v911_v48 = vpop.f32.mrf.mxu0 }
 0x450   : > { %v966_v49 = vpop.f32.mrf.mxu1 }
 0x451   : > { %1442 = vtanh.f32 %v976_v47  ;;  %v1266_v50 = vpop.f32.mrf.mxu0 }
 0x452   : > { %v1274_v51 = vpop.f32.mrf.mxu1 }
 0x45e   : > { %v1443_v52 = vpop.eup %1442 }
 0x45f   : > { %978 = vst.msk [vmem:[#allocation18] sm:$0x3] %vm671_vm5, %v1443_v52 }
 0x460 PF: > { %s1226_s21 = sshll.u32 %s695_s17, 4  ;;  %s1010_s6 = sshll.u32 %s2132_s20, 4  ;;  %s1011_s6 = int_to_ptr.vmem [resolvable:$true] %s1010_s6 }
 0x461   : > { %s1008_s5 = scalar_lea.hbm %s2282_s11, %s1226_s21  ;;  %s984_s24 = scalar_lea.sflag [#allocation17], %s464_s0 }
 0x462   : > { %s1604_s26 = scalar_lea.vmem %s1011_s6, 16  ;;  %p2348_p1 = scmp.ne.s32.totalorder %s2333_s3, 0 }
 0x463   : > { %p1605_p3 = scmp.ne.s32.totalorder %s1011_s6, %s1604_s26  ;;  %s1786_s13 = smov [#allocation16]  }
 0x464   : > { %s1608_s12 = sshll.u32 %s1786_s13, 4  ;;  %s1609_s12 = int_to_ptr.vmem [resolvable:$false] %s1608_s12 }
 0x465   : > { %p1606_p9 = pnand %p1605_p3, %p2348_p1  ;;  %s1610_s18 = scalar_lea.vmem %s1609_s12, 32 }
 0x466   : > { %p1611_p4 = scmp.lt.s32.totalorder %s1011_s6, %s1609_s12  ;;  %p1612_p2 = scmp.lt.s32.totalorder %s1610_s18, %s1604_s26 }
 0x467   : > { %p1607_p11 = pneg %p1606_p9 }
 0x468   : > { %p1613_p8 = por %p1612_p2, %p1611_p4 }
 0x46a   : > { %p1614_p12 = pnand %p1613_p8, %p1607_p11 }
 0x46c   : > { %1617 = shalt.err (!%p1614_p12)
}
 0x46d   : > { %s1618_s17 = scalar_lea.hbm %s1008_s5, 16  ;;  %s1622_s16 = scalar_lea.hbm %s2282_s11, 128 }
 0x46e   : > { %p1619_p7 = scmp.ne.s32.totalorder %s1008_s5, %s1618_s17  ;;  %p1623_p6 = scmp.lt.s32.totalorder %s1008_s5, %s2282_s11 }
 0x46f   : > { %p1624_p5 = scmp.lt.s32.totalorder %s1622_s16, %s1618_s17 }
 0x470   : > { %p1620_p13 = pnand %p1619_p7, %p2348_p1 }
 0x471   : > { %p1625_p10 = por %p1624_p5, %p1623_p6 }
 0x472   : > { %p1621_p0 = pneg %p1620_p13 }
 0x474   : > { %p1626_p3 = pnand %p1625_p10, %p1621_p0 }
 0x476   : > { %1629 = shalt.err (!%p1626_p3)
}
 0x477   : > { %s2349_s15 = sld [smem:[#allocation29_spill]]  ;;  %s1225_s14 = sshll.u32 %s1890_s30, 4 }
 0x478   : > { %1296 = dma.vmem_to_hbm [thread:$0]  (%p2348_p1), %s1011_s6, 16, %s1008_s5, %s984_s24  }
 0x479   : > { %s996_s26 = sshll.u32 %s524_s19, 4  ;;  %s2350_s18 = sld [smem:[#allocation38_spill]]  ;;  %s997_s26 = int_to_ptr.vmem [resolvable:$true] %s996_s26 }
 0x47a   : > { %s980_s20 = scalar_lea.sflag [#allocation6], %s2098_s7  ;;  %s1630_s17 = scalar_lea.vmem %s997_s26, 16 }
 0x47b   : > { %p1631_p9 = scmp.ne.s32.totalorder %s997_s26, %s1630_s17  ;;  %s1787_s3 = smov [#allocation15]  }
 0x47c   : > { %s1634_s16 = sshll.u32 %s1787_s3, 4  ;;  %s1635_s16 = int_to_ptr.vmem [resolvable:$false] %s1634_s16 }
 0x47d   : > { %p2351_p11 = scmp.ne.s32.totalorder %s2349_s15, 0  ;;  %s1636_s28 = scalar_lea.vmem %s1635_s16, 32 }
 0x47e   : > { %p1637_p8 = scmp.lt.s32.totalorder %s997_s26, %s1635_s16  ;;  %p1638_p1 = scmp.lt.s32.totalorder %s1636_s28, %s1630_s17 }
 0x47f   : > { %s994_s0 = scalar_lea.hbm %s2350_s18, %s1225_s14  ;;  %p1632_p4 = pnand %p1631_p9, %p2351_p11 }
 0x480   : > { %p1639_p12 = por %p1638_p1, %p1637_p8 }
 0x481   : > { %p1633_p2 = pneg %p1632_p4 }
 0x483   : > { %p1640_p7 = pnand %p1639_p12, %p1633_p2 }
 0x485   : > { %1643 = shalt.err (!%p1640_p7)
}
 0x486   : > { %s1644_s19 = scalar_lea.hbm %s994_s0, 16  ;;  %s1648_s6 = scalar_lea.hbm %s2350_s18, 128 }
 0x487   : > { %p1645_p13 = scmp.ne.s32.totalorder %s994_s0, %s1644_s19  ;;  %p1649_p5 = scmp.lt.s32.totalorder %s994_s0, %s2350_s18 }
 0x488   : > { %p1650_p10 = scmp.lt.s32.totalorder %s1648_s6, %s1644_s19 }
 0x489   : > { %p1646_p0 = pnand %p1645_p13, %p2351_p11 }
 0x48a   : > { %p1651_p3 = por %p1650_p10, %p1649_p5 }
 0x48b   : > { %p1647_p6 = pneg %p1646_p0 }
 0x48d   : > { %p1652_p9 = pnand %p1651_p3, %p1647_p6 }
 0x48f   : > { %1655 = shalt.err (!%p1652_p9)
}
 0x490   : > { %1295 = dma.vmem_to_hbm [thread:$0]  (%p2351_p11), %s997_s26, 16, %s994_s0, %s980_s20  }
 0x491   : > { %s1788_s14 = smov [#allocation18]   ;;  %p2352_p2 = scmp.eq.s32.totalorder %s1890_s30, 7 }
 0x492   : > { %s1021_s13 = sshll.u32 %s1788_s14, 4  ;;  %s1022_s13 = int_to_ptr.vmem [resolvable:$true] %s1021_s13 }
 0x493   : > { %s1656_s12 = scalar_lea.vmem %s1022_s13, 32  ;;  %p1663_p12 = scmp.lt.s32.totalorder %s1022_s13, %s1022_s13 }
 0x494   : > { %p1657_p4 = scmp.ne.s32.totalorder %s1022_s13, %s1656_s12  ;;  %p1664_p7 = scmp.lt.s32.totalorder %s1656_s12, %s1656_s12 }
 0x496   : > { %p1658_p8 = pnand %p1657_p4, %p2352_p2  ;;  %p1665_p13 = por %p1664_p7, %p1663_p12 }
 0x498   : > { %p1659_p1 = pneg %p1658_p8 }
 0x49a   : > { %p1666_p0 = pnand %p1665_p13, %p1659_p1 }
 0x49c   : > { %1669 = shalt.err (!%p1666_p0)
}
 0x49d   : > { %p2353_p6 = pmov %p2352_p2  ;;  %s2354_s15 = sld [smem:[#allocation39_spill]] }
 0x49e   : > { %p2355_p11 = pmov %p2352_p2 }
 0x4a3   : > { %1298 = dma.vmem_to_hbm [thread:$0]  (%p2353_p6), %s1022_s13, 32, %s2354_s15, [#allocation17]  }
 0x4a4   : > { %1729 = dma.done.wait (%p2355_p11), [#allocation17], 32   ;;  %p2356_p5 = pmov %p2352_p2 }
 0x4a6   : > { %1731 = vsyncadd (%p2356_p5), [#allocation17], 4294967264 }
 0x4a7 PF: > { %s2357_s26 = sld [smem:[#allocation27_spill]]  ;;  %p1341_p10 = scmp.ge.s32.totalorder %s1766_s27, 2 }
 0x4a8   : > { %s2358_s0 = sld [smem:[#allocation30_spill]] }
 0x4ad   : > { %s1037_s20 = sand.u32 1, %s2357_s26  }
 0x4ae   : > { %p2359_p3 = scmp.ne.s32.totalorder %s2358_s0, 0  ;;  %s1038_s16 = scalar_lea.sflag [#allocation6], %s1037_s20 }
 0x4b0   : > { %p1324_p9 = pnand %p1341_p10, %p2359_p3 }
 0x4b2   : > { %p1325_p4 = pneg %p1324_p9 }
 0x4b4   : > { %1733 = dma.done.wait (%p1325_p4), %s1038_s16, 16  }
 0x4b5   : > { %1735 = vsyncadd (%p1325_p4), %s1038_s16, 4294967280  ;;  %s2360_s28 = sadd.s32 4294967294, %s1766_s27   ;;  %p2361_p2 = scmp.ne.s32.totalorder %s2335_s29, 0 }
 0x4b6   : > { %s1045_s19 = sand.u32 1, %s2360_s28  }
 0x4b7   : > { %p1327_p8 = pnand %p1341_p10, %p2361_p2  ;;  %s1046_s30 = scalar_lea.sflag [#allocation17], %s1045_s19 }
 0x4b9   : > { %p1328_p1 = pneg %p1327_p8 }
 0x4bb   : > { %1737 = dma.done.wait (%p1328_p1), %s1046_s30, 16  }
 0x4bc   : > { %1739 = vsyncadd (%p1328_p1), %s1046_s30, 4294967280  ;;  %s2362_s7 = sld [smem:[#allocation32_spill]]  ;;  %p34_p12 = scmp.ge.s32.totalorder %s2029_s10, 10  }
 0x4bd   : > { %s2363_s5 = sld [smem:[#allocation28_spill]]  ;;  %s2365_s21 = smov %s1746_s22 }
 0x4be   : > { %s2364_s26 = sld [smem:[#allocation31_spill]]  ;;  %s2366_s22 = smov %s1750_s23 }
 0x4bf   : > { %s2368_s24 = smov %s1758_s25  ;;  %s2370_s27 = smov %s2029_s10 }
 0x4c0   :  { %36 = sbr.rel (!%p34_p12) target bundleno = 21 (0x15), region = 167 }
 0x4c2   : > { %s2367_s23 = smov %s2362_s7 }
 0x4c3   : > { %s2369_s25 = smov %s2363_s5 }
 0x4c5   :  { %1050 = vsyncpa [#allocation5], 1 }
 0x4c6   :  { %1052 = vsyncpa [#allocation5 + $0x1], 1 }
 0x4c7   :  { %1053 = vsyncpa [#allocation8], 1 }
 0x4c8   :  { %1055 = vsyncpa [#allocation8 + $0x1], 1 }
 0x4c9   :  { %1056 = vsyncpa [#allocation11], 1 }
 0x4ca   :  { %1057 = vsyncpa [#allocation14], 1 }
 0x4cb   :  { %1058 = vsyncpa [#allocation6], 1 }
 0x4cc   :  { %1060 = vsyncpa [#allocation6 + $0x1], 1 }
 0x4cd   :  { %1061 = vsyncpa [#allocation17], 1 }
 0x4ce   :  { %1063 = vsyncpa [#allocation17 + $0x1], 1 }

</bundles_post_ra>
